<compile_context>
chip_gen: v7x
topology: tpu7x:2x2x1
jax: 0.10.0
libtpu: 0.0.40
codegen_flags: <defaults>
</compile_context>

<pallas_src>
import math

import jax
import jax.numpy as jnp
from jax.experimental import pallas as pl
from jax.experimental.pallas import tpu as pltpu


# ----------------------------------------------------------------------------
# Model configuration (small, synthetic CLIP-ViT)
# ----------------------------------------------------------------------------
BATCH = 2
IN_CH = 3
IMG = 16
PATCH = 8
GRID = IMG // PATCH                  # 2
NUM_PATCHES = GRID * GRID            # 4
SEQ = NUM_PATCHES + 1                # 5 (cls token + patches)
SEQ_PAD = 8                          # padded sequence length (sublane multiple)
WIDTH = 32                           # transformer width (d_model)
NUM_HEADS = 4
HEAD_DIM = WIDTH // NUM_HEADS        # 8
NUM_LAYERS = 2
MLP_DIM = 4 * WIDTH                  # 128
OUT_DIM = 16                         # visual.output_dim
PATCH_DIM = IN_CH * PATCH * PATCH    # 192
LN_EPS = 1e-5

# advisory cost estimate (per image, summed over matmuls / transcendentals)
_FLOPS_PER_IMAGE = (
    2 * SEQ_PAD * PATCH_DIM * WIDTH
    + NUM_LAYERS * (
        3 * 2 * SEQ_PAD * WIDTH * WIDTH                       # q, k, v projections
        + 2 * 2 * NUM_HEADS * SEQ_PAD * SEQ_PAD * HEAD_DIM    # scores + p@v
        + 2 * SEQ_PAD * WIDTH * WIDTH                         # out projection
        + 2 * 2 * SEQ_PAD * WIDTH * MLP_DIM                   # fc1 + fc2
    )
    + 2 * WIDTH * OUT_DIM
)
_TRANS_PER_IMAGE = NUM_LAYERS * (
    NUM_HEADS * SEQ_PAD * SEQ_PAD      # softmax exp
    + NUM_HEADS * SEQ_PAD              # approx reciprocal
    + SEQ_PAD * MLP_DIM                # QuickGELU sigmoid
)


# ----------------------------------------------------------------------------
# Fused Pallas kernel: one grid step == full encode_image forward for one image
# ----------------------------------------------------------------------------
def _clip_fused_kernel(
    patches_ref,                      # [SEQ_PAD, PATCH_DIM] bf16 (cls/pad rows = 0)
    conv_w_ref,                       # [PATCH_DIM, WIDTH]   bf16 (conv1, pre-flattened)
    embed_ref,                        # [SEQ_PAD, WIDTH]     f32  (cls_emb + pos_emb, pad rows 0)
    kbias_ref,                        # [1, 1, SEQ_PAD]      f32  (0 for valid keys, -1e9 for pad)
    ln_pre_g_ref, ln_pre_b_ref,       # [1, WIDTH]
    ln1_g_ref, ln1_b_ref,             # [L, 1, WIDTH]
    qkv_w_ref,                        # [L, 3, WIDTH, WIDTH] bf16
    qkv_b_ref,                        # [L, 3, 1, WIDTH]
    out_w_ref,                        # [L, WIDTH, WIDTH]    bf16
    out_b_ref,                        # [L, 1, WIDTH]
    ln2_g_ref, ln2_b_ref,             # [L, 1, WIDTH]
    fc1_w_ref,                        # [L, WIDTH, MLP_DIM]  bf16
    fc1_b_ref,                        # [L, 1, MLP_DIM]
    fc2_w_ref,                        # [L, MLP_DIM, WIDTH]  bf16
    fc2_b_ref,                        # [L, 1, WIDTH]
    gate_ref,                         # [L, 1, WIDTH]  (per-head gate expanded over head cols)
    ln_post_g_ref, ln_post_b_ref,     # [1, WIDTH]
    proj_ref,                         # [WIDTH, OUT_DIM]     bf16
    out_ref,                          # [1, OUT_DIM]
):
    f32 = jnp.float32
    bf16 = jnp.bfloat16
    scale = 1.0 / math.sqrt(HEAD_DIM)

    def ln(x, g, b):
        mean = jnp.mean(x, axis=-1, keepdims=True)
        xc = x - mean
        var = jnp.mean(xc * xc, axis=-1, keepdims=True)
        return (xc * jax.lax.rsqrt(var + LN_EPS)) * g + b

    # --- patch embedding (stride == kernel conv1 -> one matmul) + cls/pos embed
    x = jnp.dot(patches_ref[...], conv_w_ref[...], preferred_element_type=f32)
    x = x + embed_ref[...]                                    # [S, W]

    # --- ln_pre
    x = ln(x, ln_pre_g_ref[...], ln_pre_b_ref[...])

    # additive bias masking padded key slots out of every softmax (precomputed)
    key_bias = kbias_ref[...]                                 # [1, 1, S]

    # --- transformer resblocks (static unroll; everything stays in VMEM/vregs)
    for l in range(NUM_LAYERS):
        # attention branch: x = x + out_proj(attn(ln_1(x)))
        h = ln(x, ln1_g_ref[l], ln1_b_ref[l]).astype(bf16)
        q = jnp.dot(h, qkv_w_ref[l, 0], preferred_element_type=f32) + qkv_b_ref[l, 0]
        k = jnp.dot(h, qkv_w_ref[l, 1], preferred_element_type=f32) + qkv_b_ref[l, 1]
        # fold the per-head pruning gate into V (== gating each head's attn output)
        v = (jnp.dot(h, qkv_w_ref[l, 2], preferred_element_type=f32)
             + qkv_b_ref[l, 2]) * gate_ref[l]

        # all heads at once: [S, W] -> [H, S, Dh]
        qh = jnp.transpose(q.reshape(SEQ_PAD, NUM_HEADS, HEAD_DIM), (1, 0, 2))
        kh = jnp.transpose(k.reshape(SEQ_PAD, NUM_HEADS, HEAD_DIM), (1, 0, 2))
        vh = jnp.transpose(v.reshape(SEQ_PAD, NUM_HEADS, HEAD_DIM), (1, 0, 2))

        s = jnp.einsum("hqd,hkd->hqk", qh, kh,
                       preferred_element_type=f32) * scale + key_bias   # [H, S, S]
        m = jnp.max(s, axis=-1, keepdims=True)
        p = jnp.exp(s - m)
        p = p * pl.reciprocal(jnp.sum(p, axis=-1, keepdims=True), approx=True)
        o = jnp.einsum("hqk,hkd->hqd", p, vh, preferred_element_type=f32)  # [H, S, Dh]
        o = jnp.transpose(o, (1, 0, 2)).reshape(SEQ_PAD, WIDTH)            # [S, W]

        x = x + jnp.dot(o.astype(bf16), out_w_ref[l],
                        preferred_element_type=f32) + out_b_ref[l]

        # MLP branch: x = x + fc2(QuickGELU(fc1(ln_2(x))))
        h = ln(x, ln2_g_ref[l], ln2_b_ref[l]).astype(bf16)
        h = jnp.dot(h, fc1_w_ref[l], preferred_element_type=f32) + fc1_b_ref[l]
        h = h * jax.nn.sigmoid(1.702 * h)                     # QuickGELU (f32)
        h = jnp.dot(h.astype(bf16), fc2_w_ref[l], preferred_element_type=f32) + fc2_b_ref[l]
        x = x + h

    # --- ln_post on the class token + final projection
    cls = x[0:1, :]                                           # [1, W]; pad rows never read back
    cls = ln(cls, ln_post_g_ref[...], ln_post_b_ref[...])
    out_ref[...] = jnp.dot(cls.astype(bf16), proj_ref[...],
                           preferred_element_type=f32).astype(out_ref.dtype)


# ----------------------------------------------------------------------------
# Parameter initialization (deterministic, synthetic, pre-transposed & stacked)
# ----------------------------------------------------------------------------
def init_params(key):
    ks = jax.random.split(key, 8)
    bf16 = jnp.bfloat16

    def nrm(k, shape, dtype=jnp.float32, s=0.02):
        return (jax.random.normal(k, shape, jnp.float32) * s).astype(dtype)

    zeros = lambda shape: jnp.zeros(shape, jnp.float32)
    ones = lambda shape: jnp.ones(shape, jnp.float32)
    L = NUM_LAYERS
    return {
        # conv1 weight already flattened+transposed to [C*P*P, WIDTH]; CLIP conv1 has no bias
        "conv1_w": nrm(ks[0], (PATCH_DIM, WIDTH), bf16),
        "class_embedding": nrm(ks[1], (WIDTH,)),
        "pos_embedding": nrm(ks[2], (SEQ, WIDTH)),
        "ln_pre_g": ones((1, WIDTH)), "ln_pre_b": zeros((1, WIDTH)),
        "ln_post_g": ones((1, WIDTH)), "ln_post_b": zeros((1, WIDTH)),
        "proj": nrm(ks[3], (WIDTH, OUT_DIM), bf16),
        # pruning_mask: nn.Parameter(zeros(num_layers, num_heads))
        "pruning_mask": zeros((L, NUM_HEADS)),
        # per-layer params, stacked over layers; weights stored [in, out] in bf16
        "ln1_g": ones((L, 1, WIDTH)), "ln1_b": zeros((L, 1, WIDTH)),
        "qkv_w": nrm(ks[4], (L, 3, WIDTH, WIDTH), bf16),
        "qkv_b": jnp.zeros((L, 3, 1, WIDTH), jnp.float32),
        "out_proj_w": nrm(ks[5], (L, WIDTH, WIDTH), bf16),
        "out_proj_b": zeros((L, 1, WIDTH)),
        "ln2_g": ones((L, 1, WIDTH)), "ln2_b": zeros((L, 1, WIDTH)),
        "fc1_w": nrm(ks[6], (L, WIDTH, MLP_DIM), bf16),
        "fc1_b": zeros((L, 1, MLP_DIM)),
        "fc2_w": nrm(ks[7], (L, MLP_DIM, WIDTH), bf16),
        "fc2_b": zeros((L, 1, WIDTH)),
    }


def _const_spec(shape):
    """Full-array block, same block index at every grid step (weights stay resident)."""
    n = len(shape)
    return pl.BlockSpec(shape, lambda b, _n=n: (0,) * _n)


# ----------------------------------------------------------------------------
# Forward pass (== model.encode_image(x)); one pallas_call per forward
# ----------------------------------------------------------------------------
@jax.jit
def clip_encode_image(x, params):
    B = x.shape[0]

    # conv1 patch extraction (stride == kernel): [B,C,H,W] -> [B, NP, C*P*P]
    p = x.reshape(B, IN_CH, GRID, PATCH, GRID, PATCH)
    p = p.transpose(0, 2, 4, 1, 3, 5).reshape(B, NUM_PATCHES, PATCH_DIM)
    # pad token axis to SEQ_PAD: slot 0 = cls (zero pixels), 1..NP = patches, rest = 0
    patches = jnp.pad(
        p, ((0, 0), (1, SEQ_PAD - 1 - NUM_PATCHES), (0, 0))).astype(jnp.bfloat16)

    # cls + positional embedding, padded to SEQ_PAD rows (shared over batch)
    cls_row = (params["class_embedding"] + params["pos_embedding"][0])[None, :]
    embed = jnp.concatenate(
        [cls_row, params["pos_embedding"][1:SEQ],
         jnp.zeros((SEQ_PAD - SEQ, WIDTH), jnp.float32)], axis=0)       # [SEQ_PAD, W]

    # per-head gate (= 1 - pruning_mask) expanded over each head's Dh columns
    gate = jnp.repeat(1.0 - params["pruning_mask"], HEAD_DIM, axis=1)
    gate = gate.reshape(NUM_LAYERS, 1, WIDTH).astype(jnp.float32)

    # additive softmax bias masking padded key slots (constant at trace time)
    kidx = jax.lax.broadcasted_iota(jnp.int32, (1, 1, SEQ_PAD), 2)
    key_bias = jnp.where(kidx < SEQ, 0.0, -1e9).astype(jnp.float32)

    operands = (
        patches, params["conv1_w"], embed, key_bias,
        params["ln_pre_g"], params["ln_pre_b"],
        params["ln1_g"], params["ln1_b"],
        params["qkv_w"], params["qkv_b"],
        params["out_proj_w"], params["out_proj_b"],
        params["ln2_g"], params["ln2_b"],
        params["fc1_w"], params["fc1_b"],
        params["fc2_w"], params["fc2_b"],
        gate,
        params["ln_post_g"], params["ln_post_b"],
        params["proj"],
    )

    bytes_accessed = sum(math.prod(a.shape) * a.dtype.itemsize for a in operands)
    bytes_accessed += B * OUT_DIM * 4
    cost = pl.CostEstimate(flops=B * _FLOPS_PER_IMAGE,
                           transcendentals=B * _TRANS_PER_IMAGE,
                           bytes_accessed=int(bytes_accessed))

    in_specs = [
        pl.BlockSpec((None, SEQ_PAD, PATCH_DIM), lambda b: (b, 0, 0)),   # patches (per image)
        _const_spec((PATCH_DIM, WIDTH)),                                 # conv1_w
        _const_spec((SEQ_PAD, WIDTH)),                                   # embed
        _const_spec((1, 1, SEQ_PAD)),                                    # key_bias
        _const_spec((1, WIDTH)), _const_spec((1, WIDTH)),                # ln_pre g/b
        _const_spec((NUM_LAYERS, 1, WIDTH)), _const_spec((NUM_LAYERS, 1, WIDTH)),  # ln1 g/b
        _const_spec((NUM_LAYERS, 3, WIDTH, WIDTH)),                      # qkv_w
        _const_spec((NUM_LAYERS, 3, 1, WIDTH)),                          # qkv_b
        _const_spec((NUM_LAYERS, WIDTH, WIDTH)),                         # out_proj_w
        _const_spec((NUM_LAYERS, 1, WIDTH)),                             # out_proj_b
        _const_spec((NUM_LAYERS, 1, WIDTH)), _const_spec((NUM_LAYERS, 1, WIDTH)),  # ln2 g/b
        _const_spec((NUM_LAYERS, WIDTH, MLP_DIM)),                       # fc1_w
        _const_spec((NUM_LAYERS, 1, MLP_DIM)),                           # fc1_b
        _const_spec((NUM_LAYERS, MLP_DIM, WIDTH)),                       # fc2_w
        _const_spec((NUM_LAYERS, 1, WIDTH)),                             # fc2_b
        _const_spec((NUM_LAYERS, 1, WIDTH)),                             # gate
        _const_spec((1, WIDTH)), _const_spec((1, WIDTH)),                # ln_post g/b
        _const_spec((WIDTH, OUT_DIM)),                                   # proj
    ]

    out = pl.pallas_call(
        _clip_fused_kernel,
        out_shape=jax.ShapeDtypeStruct((B, 1, OUT_DIM), jnp.float32),
        grid=(B,),
        in_specs=in_specs,
        out_specs=pl.BlockSpec((None, 1, OUT_DIM), lambda b: (b, 0, 0)),
        compiler_params=pltpu.CompilerParams(
            dimension_semantics=("parallel",)),       # v7x: split batch over 2 TCs
        cost_estimate=cost,
    )(*operands)
    return out.reshape(B, OUT_DIM)


# ----------------------------------------------------------------------------
if __name__ == "__main__":
    key = jax.random.PRNGKey(0)
    kx, kp = jax.random.split(key)
    x = jax.random.normal(kx, (BATCH, IN_CH, IMG, IMG), dtype=jnp.float32)
    params = init_params(kp)

    out = clip_encode_image(x, params)
    out = jax.block_until_ready(out)
    assert out.shape == (BATCH, OUT_DIM)
    assert bool(jnp.all(jnp.isfinite(out)))
    print("KERNEL_OK")
</pallas_src>

<mosaic_0001>
module attributes {stable_mosaic.version = 11 : i64} {
  func.func @_clip_fused_kernel(%arg0: i32, %arg1: memref<1x8x192xbf16, #tpu.memory_space<vmem>>, %arg2: memref<192x32xbf16, #tpu.memory_space<vmem>>, %arg3: memref<8x32xf32, #tpu.memory_space<vmem>>, %arg4: memref<1x1x8xf32, #tpu.memory_space<vmem>>, %arg5: memref<1x32xf32, #tpu.memory_space<vmem>>, %arg6: memref<1x32xf32, #tpu.memory_space<vmem>>, %arg7: memref<2x1x32xf32, #tpu.memory_space<vmem>>, %arg8: memref<2x1x32xf32, #tpu.memory_space<vmem>>, %arg9: memref<2x3x32x32xbf16, #tpu.memory_space<vmem>>, %arg10: memref<2x3x1x32xf32, #tpu.memory_space<vmem>>, %arg11: memref<2x32x32xbf16, #tpu.memory_space<vmem>>, %arg12: memref<2x1x32xf32, #tpu.memory_space<vmem>>, %arg13: memref<2x1x32xf32, #tpu.memory_space<vmem>>, %arg14: memref<2x1x32xf32, #tpu.memory_space<vmem>>, %arg15: memref<2x32x128xbf16, #tpu.memory_space<vmem>>, %arg16: memref<2x1x128xf32, #tpu.memory_space<vmem>>, %arg17: memref<2x128x32xbf16, #tpu.memory_space<vmem>>, %arg18: memref<2x1x32xf32, #tpu.memory_space<vmem>>, %arg19: memref<2x1x32xf32, #tpu.memory_space<vmem>>, %arg20: memref<1x32xf32, #tpu.memory_space<vmem>>, %arg21: memref<1x32xf32, #tpu.memory_space<vmem>>, %arg22: memref<32x16xbf16, #tpu.memory_space<vmem>>, %arg23: memref<1x1x16xf32, #tpu.memory_space<vmem>>) attributes {dimension_semantics = [#tpu.dimension_semantics<parallel>], iteration_bounds = array<i64: 2>, scalar_prefetch = 0 : i64, scratch_operands = 0 : i64, tpu.core_type = #tpu.core_type<tc>, window_params = [{transform_indices = @transform_0, window_bounds = array<i64: 1, 8, 192>}, {pipeline_mode = #tpu.pipeline_mode<synchronous>, transform_indices = @transform_1, window_bounds = array<i64: 192, 32>}, {pipeline_mode = #tpu.pipeline_mode<synchronous>, transform_indices = @transform_2, window_bounds = array<i64: 8, 32>}, {pipeline_mode = #tpu.pipeline_mode<synchronous>, transform_indices = @transform_3, window_bounds = array<i64: 1, 1, 8>}, {pipeline_mode = #tpu.pipeline_mode<synchronous>, transform_indices = @transform_4, window_bounds = array<i64: 1, 32>}, {pipeline_mode = #tpu.pipeline_mode<synchronous>, transform_indices = @transform_5, window_bounds = array<i64: 1, 32>}, {pipeline_mode = #tpu.pipeline_mode<synchronous>, transform_indices = @transform_6, window_bounds = array<i64: 2, 1, 32>}, {pipeline_mode = #tpu.pipeline_mode<synchronous>, transform_indices = @transform_7, window_bounds = array<i64: 2, 1, 32>}, {pipeline_mode = #tpu.pipeline_mode<synchronous>, transform_indices = @transform_8, window_bounds = array<i64: 2, 3, 32, 32>}, {pipeline_mode = #tpu.pipeline_mode<synchronous>, transform_indices = @transform_9, window_bounds = array<i64: 2, 3, 1, 32>}, {pipeline_mode = #tpu.pipeline_mode<synchronous>, transform_indices = @transform_10, window_bounds = array<i64: 2, 32, 32>}, {pipeline_mode = #tpu.pipeline_mode<synchronous>, transform_indices = @transform_11, window_bounds = array<i64: 2, 1, 32>}, {pipeline_mode = #tpu.pipeline_mode<synchronous>, transform_indices = @transform_12, window_bounds = array<i64: 2, 1, 32>}, {pipeline_mode = #tpu.pipeline_mode<synchronous>, transform_indices = @transform_13, window_bounds = array<i64: 2, 1, 32>}, {pipeline_mode = #tpu.pipeline_mode<synchronous>, transform_indices = @transform_14, window_bounds = array<i64: 2, 32, 128>}, {pipeline_mode = #tpu.pipeline_mode<synchronous>, transform_indices = @transform_15, window_bounds = array<i64: 2, 1, 128>}, {pipeline_mode = #tpu.pipeline_mode<synchronous>, transform_indices = @transform_16, window_bounds = array<i64: 2, 128, 32>}, {pipeline_mode = #tpu.pipeline_mode<synchronous>, transform_indices = @transform_17, window_bounds = array<i64: 2, 1, 32>}, {pipeline_mode = #tpu.pipeline_mode<synchronous>, transform_indices = @transform_18, window_bounds = array<i64: 2, 1, 32>}, {pipeline_mode = #tpu.pipeline_mode<synchronous>, transform_indices = @transform_19, window_bounds = array<i64: 1, 32>}, {pipeline_mode = #tpu.pipeline_mode<synchronous>, transform_indices = @transform_20, window_bounds = array<i64: 1, 32>}, {pipeline_mode = #tpu.pipeline_mode<synchronous>, transform_indices = @transform_21, window_bounds = array<i64: 32, 16>}, {transform_indices = @transform_22, window_bounds = array<i64: 1, 1, 16>}]} {
    %c0 = arith.constant 0 : index
    %c0_0 = arith.constant 0 : index
    %c0_1 = arith.constant 0 : index
    %0 = vector.load %arg1[%c0, %c0_0, %c0_1] : memref<1x8x192xbf16, #tpu.memory_space<vmem>>, vector<1x8x192xbf16>
    %1 = vector.shape_cast %0 : vector<1x8x192xbf16> to vector<8x192xbf16>
    %c0_2 = arith.constant 0 : index
    %c0_3 = arith.constant 0 : index
    %2 = vector.load %arg2[%c0_2, %c0_3] : memref<192x32xbf16, #tpu.memory_space<vmem>>, vector<192x32xbf16>
    %cst = arith.constant dense<0.000000e+00> : vector<8x32xf32>
    %3 = tpu.matmul %1, %2, %cst {dimension_numbers = #tpu.dot_dimension_numbers<[1], [0], [0], [1], [0, 0, 1, 1], [], []>} : vector<8x192xbf16>, vector<192x32xbf16>, vector<8x32xf32> -> vector<8x32xf32>
    %c0_4 = arith.constant 0 : index
    %c0_5 = arith.constant 0 : index
    %4 = vector.load %arg3[%c0_4, %c0_5] : memref<8x32xf32, #tpu.memory_space<vmem>>, vector<8x32xf32>
    %5 = arith.addf %3, %4 : vector<8x32xf32>
    %c0_6 = arith.constant 0 : index
    %c0_7 = arith.constant 0 : index
    %6 = vector.load %arg5[%c0_6, %c0_7] : memref<1x32xf32, #tpu.memory_space<vmem>>, vector<1x32xf32>
    %c0_8 = arith.constant 0 : index
    %c0_9 = arith.constant 0 : index
    %7 = vector.load %arg6[%c0_8, %c0_9] : memref<1x32xf32, #tpu.memory_space<vmem>>, vector<1x32xf32>
    %cst_10 = arith.constant dense<0.000000e+00> : vector<8xf32>
    %8 = vector.multi_reduction <add>, %5, %cst_10 [1] : vector<8x32xf32> to vector<8xf32>
    %9 = vector.shape_cast %8 : vector<8xf32> to vector<8x1xf32>
    %cst_11 = arith.constant 3.200000e+01 : f32
    %10 = vector.broadcast %cst_11 : f32 to vector<8x1xf32>
    %11 = arith.divf %9, %10 : vector<8x1xf32>
    %12 = vector.broadcast %11 : vector<8x1xf32> to vector<8x32xf32>
    %13 = arith.subf %5, %12 : vector<8x32xf32>
    %14 = arith.mulf %13, %13 : vector<8x32xf32>
    %cst_12 = arith.constant dense<0.000000e+00> : vector<8xf32>
    %15 = vector.multi_reduction <add>, %14, %cst_12 [1] : vector<8x32xf32> to vector<8xf32>
    %16 = vector.shape_cast %15 : vector<8xf32> to vector<8x1xf32>
    %cst_13 = arith.constant 3.200000e+01 : f32
    %17 = vector.broadcast %cst_13 : f32 to vector<8x1xf32>
    %18 = arith.divf %16, %17 : vector<8x1xf32>
    %cst_14 = arith.constant 9.99999974E-6 : f32
    %19 = vector.broadcast %cst_14 : f32 to vector<8x1xf32>
    %20 = arith.addf %18, %19 : vector<8x1xf32>
    %21 = math.rsqrt %20 : vector<8x1xf32>
    %22 = vector.broadcast %21 : vector<8x1xf32> to vector<8x32xf32>
    %23 = arith.mulf %13, %22 : vector<8x32xf32>
    %24 = vector.broadcast %6 : vector<1x32xf32> to vector<8x32xf32>
    %25 = arith.mulf %23, %24 : vector<8x32xf32>
    %26 = vector.broadcast %7 : vector<1x32xf32> to vector<8x32xf32>
    %27 = arith.addf %25, %26 : vector<8x32xf32>
    %c0_15 = arith.constant 0 : index
    %c0_16 = arith.constant 0 : index
    %c0_17 = arith.constant 0 : index
    %28 = vector.load %arg4[%c0_15, %c0_16, %c0_17] : memref<1x1x8xf32, #tpu.memory_space<vmem>>, vector<1x1x8xf32>
    %c0_18 = arith.constant 0 : index
    %c0_19 = arith.constant 0 : index
    %c0_20 = arith.constant 0 : index
    %29 = vector.load %arg7[%c0_18, %c0_19, %c0_20] : memref<2x1x32xf32, #tpu.memory_space<vmem>>, vector<1x1x32xf32>
    %30 = vector.shape_cast %29 : vector<1x1x32xf32> to vector<1x32xf32>
    %c0_21 = arith.constant 0 : index
    %c0_22 = arith.constant 0 : index
    %c0_23 = arith.constant 0 : index
    %31 = vector.load %arg8[%c0_21, %c0_22, %c0_23] : memref<2x1x32xf32, #tpu.memory_space<vmem>>, vector<1x1x32xf32>
    %32 = vector.shape_cast %31 : vector<1x1x32xf32> to vector<1x32xf32>
    %cst_24 = arith.constant dense<0.000000e+00> : vector<8xf32>
    %33 = vector.multi_reduction <add>, %27, %cst_24 [1] : vector<8x32xf32> to vector<8xf32>
    %34 = vector.shape_cast %33 : vector<8xf32> to vector<8x1xf32>
    %cst_25 = arith.constant 3.200000e+01 : f32
    %35 = vector.broadcast %cst_25 : f32 to vector<8x1xf32>
    %36 = arith.divf %34, %35 : vector<8x1xf32>
    %37 = vector.broadcast %36 : vector<8x1xf32> to vector<8x32xf32>
    %38 = arith.subf %27, %37 : vector<8x32xf32>
    %39 = arith.mulf %38, %38 : vector<8x32xf32>
    %cst_26 = arith.constant dense<0.000000e+00> : vector<8xf32>
    %40 = vector.multi_reduction <add>, %39, %cst_26 [1] : vector<8x32xf32> to vector<8xf32>
    %41 = vector.shape_cast %40 : vector<8xf32> to vector<8x1xf32>
    %cst_27 = arith.constant 3.200000e+01 : f32
    %42 = vector.broadcast %cst_27 : f32 to vector<8x1xf32>
    %43 = arith.divf %41, %42 : vector<8x1xf32>
    %cst_28 = arith.constant 9.99999974E-6 : f32
    %44 = vector.broadcast %cst_28 : f32 to vector<8x1xf32>
    %45 = arith.addf %43, %44 : vector<8x1xf32>
    %46 = math.rsqrt %45 : vector<8x1xf32>
    %47 = vector.broadcast %46 : vector<8x1xf32> to vector<8x32xf32>
    %48 = arith.mulf %38, %47 : vector<8x32xf32>
    %49 = vector.broadcast %30 : vector<1x32xf32> to vector<8x32xf32>
    %50 = arith.mulf %48, %49 : vector<8x32xf32>
    %51 = vector.broadcast %32 : vector<1x32xf32> to vector<8x32xf32>
    %52 = arith.addf %50, %51 : vector<8x32xf32>
    %53 = arith.truncf %52 : vector<8x32xf32> to vector<8x32xbf16>
    %c0_29 = arith.constant 0 : index
    %c0_30 = arith.constant 0 : index
    %c0_31 = arith.constant 0 : index
    %c0_32 = arith.constant 0 : index
    %54 = vector.load %arg9[%c0_29, %c0_30, %c0_31, %c0_32] : memref<2x3x32x32xbf16, #tpu.memory_space<vmem>>, vector<1x1x32x32xbf16>
    %55 = vector.shape_cast %54 : vector<1x1x32x32xbf16> to vector<32x32xbf16>
    %cst_33 = arith.constant dense<0.000000e+00> : vector<8x32xf32>
    %56 = tpu.matmul %53, %55, %cst_33 {dimension_numbers = #tpu.dot_dimension_numbers<[1], [0], [0], [1], [0, 0, 1, 1], [], []>} : vector<8x32xbf16>, vector<32x32xbf16>, vector<8x32xf32> -> vector<8x32xf32>
    %c0_34 = arith.constant 0 : index
    %c0_35 = arith.constant 0 : index
    %c0_36 = arith.constant 0 : index
    %c0_37 = arith.constant 0 : index
    %57 = vector.load %arg10[%c0_34, %c0_35, %c0_36, %c0_37] : memref<2x3x1x32xf32, #tpu.memory_space<vmem>>, vector<1x1x1x32xf32>
    %58 = vector.shape_cast %57 : vector<1x1x1x32xf32> to vector<1x32xf32>
    %59 = vector.broadcast %58 : vector<1x32xf32> to vector<8x32xf32>
    %60 = arith.addf %56, %59 : vector<8x32xf32>
    %c0_38 = arith.constant 0 : index
    %c1 = arith.constant 1 : index
    %c0_39 = arith.constant 0 : index
    %c0_40 = arith.constant 0 : index
    %61 = vector.load %arg9[%c0_38, %c1, %c0_39, %c0_40] : memref<2x3x32x32xbf16, #tpu.memory_space<vmem>>, vector<1x1x32x32xbf16>
    %62 = vector.shape_cast %61 : vector<1x1x32x32xbf16> to vector<32x32xbf16>
    %cst_41 = arith.constant dense<0.000000e+00> : vector<8x32xf32>
    %63 = tpu.matmul %53, %62, %cst_41 {dimension_numbers = #tpu.dot_dimension_numbers<[1], [0], [0], [1], [0, 0, 1, 1], [], []>} : vector<8x32xbf16>, vector<32x32xbf16>, vector<8x32xf32> -> vector<8x32xf32>
    %c0_42 = arith.constant 0 : index
    %c1_43 = arith.constant 1 : index
    %c0_44 = arith.constant 0 : index
    %c0_45 = arith.constant 0 : index
    %64 = vector.load %arg10[%c0_42, %c1_43, %c0_44, %c0_45] : memref<2x3x1x32xf32, #tpu.memory_space<vmem>>, vector<1x1x1x32xf32>
    %65 = vector.shape_cast %64 : vector<1x1x1x32xf32> to vector<1x32xf32>
    %66 = vector.broadcast %65 : vector<1x32xf32> to vector<8x32xf32>
    %67 = arith.addf %63, %66 : vector<8x32xf32>
    %c0_46 = arith.constant 0 : index
    %c2 = arith.constant 2 : index
    %c0_47 = arith.constant 0 : index
    %c0_48 = arith.constant 0 : index
    %68 = vector.load %arg9[%c0_46, %c2, %c0_47, %c0_48] : memref<2x3x32x32xbf16, #tpu.memory_space<vmem>>, vector<1x1x32x32xbf16>
    %69 = vector.shape_cast %68 : vector<1x1x32x32xbf16> to vector<32x32xbf16>
    %cst_49 = arith.constant dense<0.000000e+00> : vector<8x32xf32>
    %70 = tpu.matmul %53, %69, %cst_49 {dimension_numbers = #tpu.dot_dimension_numbers<[1], [0], [0], [1], [0, 0, 1, 1], [], []>} : vector<8x32xbf16>, vector<32x32xbf16>, vector<8x32xf32> -> vector<8x32xf32>
    %c0_50 = arith.constant 0 : index
    %c2_51 = arith.constant 2 : index
    %c0_52 = arith.constant 0 : index
    %c0_53 = arith.constant 0 : index
    %71 = vector.load %arg10[%c0_50, %c2_51, %c0_52, %c0_53] : memref<2x3x1x32xf32, #tpu.memory_space<vmem>>, vector<1x1x1x32xf32>
    %72 = vector.shape_cast %71 : vector<1x1x1x32xf32> to vector<1x32xf32>
    %73 = vector.broadcast %72 : vector<1x32xf32> to vector<8x32xf32>
    %74 = arith.addf %70, %73 : vector<8x32xf32>
    %c0_54 = arith.constant 0 : index
    %c0_55 = arith.constant 0 : index
    %c0_56 = arith.constant 0 : index
    %75 = vector.load %arg19[%c0_54, %c0_55, %c0_56] : memref<2x1x32xf32, #tpu.memory_space<vmem>>, vector<1x1x32xf32>
    %76 = vector.shape_cast %75 : vector<1x1x32xf32> to vector<1x32xf32>
    %77 = vector.broadcast %76 : vector<1x32xf32> to vector<8x32xf32>
    %78 = arith.mulf %74, %77 : vector<8x32xf32>
    %79 = vector.shape_cast %60 : vector<8x32xf32> to vector<8x4x8xf32>
    %80 = tpu.transpose %79, [1, 0, 2] : vector<8x4x8xf32> -> vector<4x8x8xf32>
    %81 = vector.shape_cast %67 : vector<8x32xf32> to vector<8x4x8xf32>
    %82 = tpu.transpose %81, [1, 0, 2] : vector<8x4x8xf32> -> vector<4x8x8xf32>
    %83 = vector.shape_cast %78 : vector<8x32xf32> to vector<8x4x8xf32>
    %84 = tpu.transpose %83, [1, 0, 2] : vector<8x4x8xf32> -> vector<4x8x8xf32>
    "tpu.trace_start"() <{level = 10 : i32, message = "hqd,hkd->hqk"}> : () -> ()
    %cst_57 = arith.constant dense<0.000000e+00> : vector<4x8x8xf32>
    %85 = tpu.matmul %80, %82, %cst_57 {dimension_numbers = #tpu.dot_dimension_numbers<[2], [2], [1], [1], [0, 0, 0, 1, 1, 1], [0], [0]>} : vector<4x8x8xf32>, vector<4x8x8xf32>, vector<4x8x8xf32> -> vector<4x8x8xf32>
    "tpu.trace_stop"() : () -> ()
    %cst_58 = arith.constant 0.353553385 : f32
    %86 = vector.broadcast %cst_58 : f32 to vector<4x8x8xf32>
    %87 = arith.mulf %85, %86 : vector<4x8x8xf32>
    %88 = vector.broadcast %28 : vector<1x1x8xf32> to vector<4x8x8xf32>
    %89 = arith.addf %87, %88 : vector<4x8x8xf32>
    %cst_59 = arith.constant dense<0xFF800000> : vector<4x8xf32>
    %90 = vector.multi_reduction <maximumf>, %89, %cst_59 [2] : vector<4x8x8xf32> to vector<4x8xf32>
    %91 = vector.shape_cast %90 : vector<4x8xf32> to vector<4x8x1xf32>
    %92 = vector.broadcast %91 : vector<4x8x1xf32> to vector<4x8x8xf32>
    %93 = arith.subf %89, %92 : vector<4x8x8xf32>
    %94 = math.exp %93 : vector<4x8x8xf32>
    %cst_60 = arith.constant dense<0.000000e+00> : vector<4x8xf32>
    %95 = vector.multi_reduction <add>, %94, %cst_60 [2] : vector<4x8x8xf32> to vector<4x8xf32>
    %96 = vector.shape_cast %95 : vector<4x8xf32> to vector<4x8x1xf32>
    %97 = tpu.reciprocal %96 {approx = true} : vector<4x8x1xf32> -> vector<4x8x1xf32>
    %98 = vector.broadcast %97 : vector<4x8x1xf32> to vector<4x8x8xf32>
    %99 = arith.mulf %94, %98 : vector<4x8x8xf32>
    "tpu.trace_start"() <{level = 10 : i32, message = "hqk,hkd->hqd"}> : () -> ()
    %cst_61 = arith.constant dense<0.000000e+00> : vector<4x8x8xf32>
    %100 = tpu.matmul %99, %84, %cst_61 {dimension_numbers = #tpu.dot_dimension_numbers<[2], [1], [1], [2], [0, 0, 0, 1, 1, 2], [0], [0]>} : vector<4x8x8xf32>, vector<4x8x8xf32>, vector<4x8x8xf32> -> vector<4x8x8xf32>
    "tpu.trace_stop"() : () -> ()
    %101 = tpu.transpose %100, [1, 0, 2] : vector<4x8x8xf32> -> vector<8x4x8xf32>
    %102 = vector.shape_cast %101 : vector<8x4x8xf32> to vector<8x32xf32>
    %103 = arith.truncf %102 : vector<8x32xf32> to vector<8x32xbf16>
    %c0_62 = arith.constant 0 : index
    %c0_63 = arith.constant 0 : index
    %c0_64 = arith.constant 0 : index
    %104 = vector.load %arg11[%c0_62, %c0_63, %c0_64] : memref<2x32x32xbf16, #tpu.memory_space<vmem>>, vector<1x32x32xbf16>
    %105 = vector.shape_cast %104 : vector<1x32x32xbf16> to vector<32x32xbf16>
    %cst_65 = arith.constant dense<0.000000e+00> : vector<8x32xf32>
    %106 = tpu.matmul %103, %105, %cst_65 {dimension_numbers = #tpu.dot_dimension_numbers<[1], [0], [0], [1], [0, 0, 1, 1], [], []>} : vector<8x32xbf16>, vector<32x32xbf16>, vector<8x32xf32> -> vector<8x32xf32>
    %107 = arith.addf %27, %106 : vector<8x32xf32>
    %c0_66 = arith.constant 0 : index
    %c0_67 = arith.constant 0 : index
    %c0_68 = arith.constant 0 : index
    %108 = vector.load %arg12[%c0_66, %c0_67, %c0_68] : memref<2x1x32xf32, #tpu.memory_space<vmem>>, vector<1x1x32xf32>
    %109 = vector.shape_cast %108 : vector<1x1x32xf32> to vector<1x32xf32>
    %110 = vector.broadcast %109 : vector<1x32xf32> to vector<8x32xf32>
    %111 = arith.addf %107, %110 : vector<8x32xf32>
    %c0_69 = arith.constant 0 : index
    %c0_70 = arith.constant 0 : index
    %c0_71 = arith.constant 0 : index
    %112 = vector.load %arg13[%c0_69, %c0_70, %c0_71] : memref<2x1x32xf32, #tpu.memory_space<vmem>>, vector<1x1x32xf32>
    %113 = vector.shape_cast %112 : vector<1x1x32xf32> to vector<1x32xf32>
    %c0_72 = arith.constant 0 : index
    %c0_73 = arith.constant 0 : index
    %c0_74 = arith.constant 0 : index
    %114 = vector.load %arg14[%c0_72, %c0_73, %c0_74] : memref<2x1x32xf32, #tpu.memory_space<vmem>>, vector<1x1x32xf32>
    %115 = vector.shape_cast %114 : vector<1x1x32xf32> to vector<1x32xf32>
    %cst_75 = arith.constant dense<0.000000e+00> : vector<8xf32>
    %116 = vector.multi_reduction <add>, %111, %cst_75 [1] : vector<8x32xf32> to vector<8xf32>
    %117 = vector.shape_cast %116 : vector<8xf32> to vector<8x1xf32>
    %cst_76 = arith.constant 3.200000e+01 : f32
    %118 = vector.broadcast %cst_76 : f32 to vector<8x1xf32>
    %119 = arith.divf %117, %118 : vector<8x1xf32>
    %120 = vector.broadcast %119 : vector<8x1xf32> to vector<8x32xf32>
    %121 = arith.subf %111, %120 : vector<8x32xf32>
    %122 = arith.mulf %121, %121 : vector<8x32xf32>
    %cst_77 = arith.constant dense<0.000000e+00> : vector<8xf32>
    %123 = vector.multi_reduction <add>, %122, %cst_77 [1] : vector<8x32xf32> to vector<8xf32>
    %124 = vector.shape_cast %123 : vector<8xf32> to vector<8x1xf32>
    %cst_78 = arith.constant 3.200000e+01 : f32
    %125 = vector.broadcast %cst_78 : f32 to vector<8x1xf32>
    %126 = arith.divf %124, %125 : vector<8x1xf32>
    %cst_79 = arith.constant 9.99999974E-6 : f32
    %127 = vector.broadcast %cst_79 : f32 to vector<8x1xf32>
    %128 = arith.addf %126, %127 : vector<8x1xf32>
    %129 = math.rsqrt %128 : vector<8x1xf32>
    %130 = vector.broadcast %129 : vector<8x1xf32> to vector<8x32xf32>
    %131 = arith.mulf %121, %130 : vector<8x32xf32>
    %132 = vector.broadcast %113 : vector<1x32xf32> to vector<8x32xf32>
    %133 = arith.mulf %131, %132 : vector<8x32xf32>
    %134 = vector.broadcast %115 : vector<1x32xf32> to vector<8x32xf32>
    %135 = arith.addf %133, %134 : vector<8x32xf32>
    %136 = arith.truncf %135 : vector<8x32xf32> to vector<8x32xbf16>
    %c0_80 = arith.constant 0 : index
    %c0_81 = arith.constant 0 : index
    %c0_82 = arith.constant 0 : index
    %137 = vector.load %arg15[%c0_80, %c0_81, %c0_82] : memref<2x32x128xbf16, #tpu.memory_space<vmem>>, vector<1x32x128xbf16>
    %138 = vector.shape_cast %137 : vector<1x32x128xbf16> to vector<32x128xbf16>
    %cst_83 = arith.constant dense<0.000000e+00> : vector<8x128xf32>
    %139 = tpu.matmul %136, %138, %cst_83 {dimension_numbers = #tpu.dot_dimension_numbers<[1], [0], [0], [1], [0, 0, 1, 1], [], []>} : vector<8x32xbf16>, vector<32x128xbf16>, vector<8x128xf32> -> vector<8x128xf32>
    %c0_84 = arith.constant 0 : index
    %c0_85 = arith.constant 0 : index
    %c0_86 = arith.constant 0 : index
    %140 = vector.load %arg16[%c0_84, %c0_85, %c0_86] : memref<2x1x128xf32, #tpu.memory_space<vmem>>, vector<1x1x128xf32>
    %141 = vector.shape_cast %140 : vector<1x1x128xf32> to vector<1x128xf32>
    %142 = vector.broadcast %141 : vector<1x128xf32> to vector<8x128xf32>
    %143 = arith.addf %139, %142 : vector<8x128xf32>
    %cst_87 = arith.constant 1.702000e+00 : f32
    %144 = vector.broadcast %cst_87 : f32 to vector<8x128xf32>
    %145 = arith.mulf %144, %143 : vector<8x128xf32>
    %146 = arith.negf %145 : vector<8x128xf32>
    %147 = math.exp %146 : vector<8x128xf32>
    %cst_88 = arith.constant 1.000000e+00 : f32
    %148 = vector.broadcast %cst_88 : f32 to vector<8x128xf32>
    %149 = arith.addf %148, %147 : vector<8x128xf32>
    %150 = arith.divf %148, %149 : vector<8x128xf32>
    %151 = arith.mulf %143, %150 : vector<8x128xf32>
    %152 = arith.truncf %151 : vector<8x128xf32> to vector<8x128xbf16>
    %c0_89 = arith.constant 0 : index
    %c0_90 = arith.constant 0 : index
    %c0_91 = arith.constant 0 : index
    %153 = vector.load %arg17[%c0_89, %c0_90, %c0_91] : memref<2x128x32xbf16, #tpu.memory_space<vmem>>, vector<1x128x32xbf16>
    %154 = vector.shape_cast %153 : vector<1x128x32xbf16> to vector<128x32xbf16>
    %cst_92 = arith.constant dense<0.000000e+00> : vector<8x32xf32>
    %155 = tpu.matmul %152, %154, %cst_92 {dimension_numbers = #tpu.dot_dimension_numbers<[1], [0], [0], [1], [0, 0, 1, 1], [], []>} : vector<8x128xbf16>, vector<128x32xbf16>, vector<8x32xf32> -> vector<8x32xf32>
    %c0_93 = arith.constant 0 : index
    %c0_94 = arith.constant 0 : index
    %c0_95 = arith.constant 0 : index
    %156 = vector.load %arg18[%c0_93, %c0_94, %c0_95] : memref<2x1x32xf32, #tpu.memory_space<vmem>>, vector<1x1x32xf32>
    %157 = vector.shape_cast %156 : vector<1x1x32xf32> to vector<1x32xf32>
    %158 = vector.broadcast %157 : vector<1x32xf32> to vector<8x32xf32>
    %159 = arith.addf %155, %158 : vector<8x32xf32>
    %160 = arith.addf %111, %159 : vector<8x32xf32>
    %c1_96 = arith.constant 1 : index
    %c0_97 = arith.constant 0 : index
    %c0_98 = arith.constant 0 : index
    %161 = vector.load %arg7[%c1_96, %c0_97, %c0_98] : memref<2x1x32xf32, #tpu.memory_space<vmem>>, vector<1x1x32xf32>
    %162 = vector.shape_cast %161 : vector<1x1x32xf32> to vector<1x32xf32>
    %c1_99 = arith.constant 1 : index
    %c0_100 = arith.constant 0 : index
    %c0_101 = arith.constant 0 : index
    %163 = vector.load %arg8[%c1_99, %c0_100, %c0_101] : memref<2x1x32xf32, #tpu.memory_space<vmem>>, vector<1x1x32xf32>
    %164 = vector.shape_cast %163 : vector<1x1x32xf32> to vector<1x32xf32>
    %cst_102 = arith.constant dense<0.000000e+00> : vector<8xf32>
    %165 = vector.multi_reduction <add>, %160, %cst_102 [1] : vector<8x32xf32> to vector<8xf32>
    %166 = vector.shape_cast %165 : vector<8xf32> to vector<8x1xf32>
    %cst_103 = arith.constant 3.200000e+01 : f32
    %167 = vector.broadcast %cst_103 : f32 to vector<8x1xf32>
    %168 = arith.divf %166, %167 : vector<8x1xf32>
    %169 = vector.broadcast %168 : vector<8x1xf32> to vector<8x32xf32>
    %170 = arith.subf %160, %169 : vector<8x32xf32>
    %171 = arith.mulf %170, %170 : vector<8x32xf32>
    %cst_104 = arith.constant dense<0.000000e+00> : vector<8xf32>
    %172 = vector.multi_reduction <add>, %171, %cst_104 [1] : vector<8x32xf32> to vector<8xf32>
    %173 = vector.shape_cast %172 : vector<8xf32> to vector<8x1xf32>
    %cst_105 = arith.constant 3.200000e+01 : f32
    %174 = vector.broadcast %cst_105 : f32 to vector<8x1xf32>
    %175 = arith.divf %173, %174 : vector<8x1xf32>
    %cst_106 = arith.constant 9.99999974E-6 : f32
    %176 = vector.broadcast %cst_106 : f32 to vector<8x1xf32>
    %177 = arith.addf %175, %176 : vector<8x1xf32>
    %178 = math.rsqrt %177 : vector<8x1xf32>
    %179 = vector.broadcast %178 : vector<8x1xf32> to vector<8x32xf32>
    %180 = arith.mulf %170, %179 : vector<8x32xf32>
    %181 = vector.broadcast %162 : vector<1x32xf32> to vector<8x32xf32>
    %182 = arith.mulf %180, %181 : vector<8x32xf32>
    %183 = vector.broadcast %164 : vector<1x32xf32> to vector<8x32xf32>
    %184 = arith.addf %182, %183 : vector<8x32xf32>
    %185 = arith.truncf %184 : vector<8x32xf32> to vector<8x32xbf16>
    %c1_107 = arith.constant 1 : index
    %c0_108 = arith.constant 0 : index
    %c0_109 = arith.constant 0 : index
    %c0_110 = arith.constant 0 : index
    %186 = vector.load %arg9[%c1_107, %c0_108, %c0_109, %c0_110] : memref<2x3x32x32xbf16, #tpu.memory_space<vmem>>, vector<1x1x32x32xbf16>
    %187 = vector.shape_cast %186 : vector<1x1x32x32xbf16> to vector<32x32xbf16>
    %cst_111 = arith.constant dense<0.000000e+00> : vector<8x32xf32>
    %188 = tpu.matmul %185, %187, %cst_111 {dimension_numbers = #tpu.dot_dimension_numbers<[1], [0], [0], [1], [0, 0, 1, 1], [], []>} : vector<8x32xbf16>, vector<32x32xbf16>, vector<8x32xf32> -> vector<8x32xf32>
    %c1_112 = arith.constant 1 : index
    %c0_113 = arith.constant 0 : index
    %c0_114 = arith.constant 0 : index
    %c0_115 = arith.constant 0 : index
    %189 = vector.load %arg10[%c1_112, %c0_113, %c0_114, %c0_115] : memref<2x3x1x32xf32, #tpu.memory_space<vmem>>, vector<1x1x1x32xf32>
    %190 = vector.shape_cast %189 : vector<1x1x1x32xf32> to vector<1x32xf32>
    %191 = vector.broadcast %190 : vector<1x32xf32> to vector<8x32xf32>
    %192 = arith.addf %188, %191 : vector<8x32xf32>
    %c1_116 = arith.constant 1 : index
    %c1_117 = arith.constant 1 : index
    %c0_118 = arith.constant 0 : index
    %c0_119 = arith.constant 0 : index
    %193 = vector.load %arg9[%c1_116, %c1_117, %c0_118, %c0_119] : memref<2x3x32x32xbf16, #tpu.memory_space<vmem>>, vector<1x1x32x32xbf16>
    %194 = vector.shape_cast %193 : vector<1x1x32x32xbf16> to vector<32x32xbf16>
    %cst_120 = arith.constant dense<0.000000e+00> : vector<8x32xf32>
    %195 = tpu.matmul %185, %194, %cst_120 {dimension_numbers = #tpu.dot_dimension_numbers<[1], [0], [0], [1], [0, 0, 1, 1], [], []>} : vector<8x32xbf16>, vector<32x32xbf16>, vector<8x32xf32> -> vector<8x32xf32>
    %c1_121 = arith.constant 1 : index
    %c1_122 = arith.constant 1 : index
    %c0_123 = arith.constant 0 : index
    %c0_124 = arith.constant 0 : index
    %196 = vector.load %arg10[%c1_121, %c1_122, %c0_123, %c0_124] : memref<2x3x1x32xf32, #tpu.memory_space<vmem>>, vector<1x1x1x32xf32>
    %197 = vector.shape_cast %196 : vector<1x1x1x32xf32> to vector<1x32xf32>
    %198 = vector.broadcast %197 : vector<1x32xf32> to vector<8x32xf32>
    %199 = arith.addf %195, %198 : vector<8x32xf32>
    %c1_125 = arith.constant 1 : index
    %c2_126 = arith.constant 2 : index
    %c0_127 = arith.constant 0 : index
    %c0_128 = arith.constant 0 : index
    %200 = vector.load %arg9[%c1_125, %c2_126, %c0_127, %c0_128] : memref<2x3x32x32xbf16, #tpu.memory_space<vmem>>, vector<1x1x32x32xbf16>
    %201 = vector.shape_cast %200 : vector<1x1x32x32xbf16> to vector<32x32xbf16>
    %cst_129 = arith.constant dense<0.000000e+00> : vector<8x32xf32>
    %202 = tpu.matmul %185, %201, %cst_129 {dimension_numbers = #tpu.dot_dimension_numbers<[1], [0], [0], [1], [0, 0, 1, 1], [], []>} : vector<8x32xbf16>, vector<32x32xbf16>, vector<8x32xf32> -> vector<8x32xf32>
    %c1_130 = arith.constant 1 : index
    %c2_131 = arith.constant 2 : index
    %c0_132 = arith.constant 0 : index
    %c0_133 = arith.constant 0 : index
    %203 = vector.load %arg10[%c1_130, %c2_131, %c0_132, %c0_133] : memref<2x3x1x32xf32, #tpu.memory_space<vmem>>, vector<1x1x1x32xf32>
    %204 = vector.shape_cast %203 : vector<1x1x1x32xf32> to vector<1x32xf32>
    %205 = vector.broadcast %204 : vector<1x32xf32> to vector<8x32xf32>
    %206 = arith.addf %202, %205 : vector<8x32xf32>
    %c1_134 = arith.constant 1 : index
    %c0_135 = arith.constant 0 : index
    %c0_136 = arith.constant 0 : index
    %207 = vector.load %arg19[%c1_134, %c0_135, %c0_136] : memref<2x1x32xf32, #tpu.memory_space<vmem>>, vector<1x1x32xf32>
    %208 = vector.shape_cast %207 : vector<1x1x32xf32> to vector<1x32xf32>
    %209 = vector.broadcast %208 : vector<1x32xf32> to vector<8x32xf32>
    %210 = arith.mulf %206, %209 : vector<8x32xf32>
    %211 = vector.shape_cast %192 : vector<8x32xf32> to vector<8x4x8xf32>
    %212 = tpu.transpose %211, [1, 0, 2] : vector<8x4x8xf32> -> vector<4x8x8xf32>
    %213 = vector.shape_cast %199 : vector<8x32xf32> to vector<8x4x8xf32>
    %214 = tpu.transpose %213, [1, 0, 2] : vector<8x4x8xf32> -> vector<4x8x8xf32>
    %215 = vector.shape_cast %210 : vector<8x32xf32> to vector<8x4x8xf32>
    %216 = tpu.transpose %215, [1, 0, 2] : vector<8x4x8xf32> -> vector<4x8x8xf32>
    "tpu.trace_start"() <{level = 10 : i32, message = "hqd,hkd->hqk"}> : () -> ()
    %cst_137 = arith.constant dense<0.000000e+00> : vector<4x8x8xf32>
    %217 = tpu.matmul %212, %214, %cst_137 {dimension_numbers = #tpu.dot_dimension_numbers<[2], [2], [1], [1], [0, 0, 0, 1, 1, 1], [0], [0]>} : vector<4x8x8xf32>, vector<4x8x8xf32>, vector<4x8x8xf32> -> vector<4x8x8xf32>
    "tpu.trace_stop"() : () -> ()
    %cst_138 = arith.constant 0.353553385 : f32
    %218 = vector.broadcast %cst_138 : f32 to vector<4x8x8xf32>
    %219 = arith.mulf %217, %218 : vector<4x8x8xf32>
    %220 = vector.broadcast %28 : vector<1x1x8xf32> to vector<4x8x8xf32>
    %221 = arith.addf %219, %220 : vector<4x8x8xf32>
    %cst_139 = arith.constant dense<0xFF800000> : vector<4x8xf32>
    %222 = vector.multi_reduction <maximumf>, %221, %cst_139 [2] : vector<4x8x8xf32> to vector<4x8xf32>
    %223 = vector.shape_cast %222 : vector<4x8xf32> to vector<4x8x1xf32>
    %224 = vector.broadcast %223 : vector<4x8x1xf32> to vector<4x8x8xf32>
    %225 = arith.subf %221, %224 : vector<4x8x8xf32>
    %226 = math.exp %225 : vector<4x8x8xf32>
    %cst_140 = arith.constant dense<0.000000e+00> : vector<4x8xf32>
    %227 = vector.multi_reduction <add>, %226, %cst_140 [2] : vector<4x8x8xf32> to vector<4x8xf32>
    %228 = vector.shape_cast %227 : vector<4x8xf32> to vector<4x8x1xf32>
    %229 = tpu.reciprocal %228 {approx = true} : vector<4x8x1xf32> -> vector<4x8x1xf32>
    %230 = vector.broadcast %229 : vector<4x8x1xf32> to vector<4x8x8xf32>
    %231 = arith.mulf %226, %230 : vector<4x8x8xf32>
    "tpu.trace_start"() <{level = 10 : i32, message = "hqk,hkd->hqd"}> : () -> ()
    %cst_141 = arith.constant dense<0.000000e+00> : vector<4x8x8xf32>
    %232 = tpu.matmul %231, %216, %cst_141 {dimension_numbers = #tpu.dot_dimension_numbers<[2], [1], [1], [2], [0, 0, 0, 1, 1, 2], [0], [0]>} : vector<4x8x8xf32>, vector<4x8x8xf32>, vector<4x8x8xf32> -> vector<4x8x8xf32>
    "tpu.trace_stop"() : () -> ()
    %233 = tpu.transpose %232, [1, 0, 2] : vector<4x8x8xf32> -> vector<8x4x8xf32>
    %234 = vector.shape_cast %233 : vector<8x4x8xf32> to vector<8x32xf32>
    %235 = arith.truncf %234 : vector<8x32xf32> to vector<8x32xbf16>
    %c1_142 = arith.constant 1 : index
    %c0_143 = arith.constant 0 : index
    %c0_144 = arith.constant 0 : index
    %236 = vector.load %arg11[%c1_142, %c0_143, %c0_144] : memref<2x32x32xbf16, #tpu.memory_space<vmem>>, vector<1x32x32xbf16>
    %237 = vector.shape_cast %236 : vector<1x32x32xbf16> to vector<32x32xbf16>
    %cst_145 = arith.constant dense<0.000000e+00> : vector<8x32xf32>
    %238 = tpu.matmul %235, %237, %cst_145 {dimension_numbers = #tpu.dot_dimension_numbers<[1], [0], [0], [1], [0, 0, 1, 1], [], []>} : vector<8x32xbf16>, vector<32x32xbf16>, vector<8x32xf32> -> vector<8x32xf32>
    %239 = arith.addf %160, %238 : vector<8x32xf32>
    %c1_146 = arith.constant 1 : index
    %c0_147 = arith.constant 0 : index
    %c0_148 = arith.constant 0 : index
    %240 = vector.load %arg12[%c1_146, %c0_147, %c0_148] : memref<2x1x32xf32, #tpu.memory_space<vmem>>, vector<1x1x32xf32>
    %241 = vector.shape_cast %240 : vector<1x1x32xf32> to vector<1x32xf32>
    %242 = vector.broadcast %241 : vector<1x32xf32> to vector<8x32xf32>
    %243 = arith.addf %239, %242 : vector<8x32xf32>
    %c1_149 = arith.constant 1 : index
    %c0_150 = arith.constant 0 : index
    %c0_151 = arith.constant 0 : index
    %244 = vector.load %arg13[%c1_149, %c0_150, %c0_151] : memref<2x1x32xf32, #tpu.memory_space<vmem>>, vector<1x1x32xf32>
    %245 = vector.shape_cast %244 : vector<1x1x32xf32> to vector<1x32xf32>
    %c1_152 = arith.constant 1 : index
    %c0_153 = arith.constant 0 : index
    %c0_154 = arith.constant 0 : index
    %246 = vector.load %arg14[%c1_152, %c0_153, %c0_154] : memref<2x1x32xf32, #tpu.memory_space<vmem>>, vector<1x1x32xf32>
    %247 = vector.shape_cast %246 : vector<1x1x32xf32> to vector<1x32xf32>
    %cst_155 = arith.constant dense<0.000000e+00> : vector<8xf32>
    %248 = vector.multi_reduction <add>, %243, %cst_155 [1] : vector<8x32xf32> to vector<8xf32>
    %249 = vector.shape_cast %248 : vector<8xf32> to vector<8x1xf32>
    %cst_156 = arith.constant 3.200000e+01 : f32
    %250 = vector.broadcast %cst_156 : f32 to vector<8x1xf32>
    %251 = arith.divf %249, %250 : vector<8x1xf32>
    %252 = vector.broadcast %251 : vector<8x1xf32> to vector<8x32xf32>
    %253 = arith.subf %243, %252 : vector<8x32xf32>
    %254 = arith.mulf %253, %253 : vector<8x32xf32>
    %cst_157 = arith.constant dense<0.000000e+00> : vector<8xf32>
    %255 = vector.multi_reduction <add>, %254, %cst_157 [1] : vector<8x32xf32> to vector<8xf32>
    %256 = vector.shape_cast %255 : vector<8xf32> to vector<8x1xf32>
    %cst_158 = arith.constant 3.200000e+01 : f32
    %257 = vector.broadcast %cst_158 : f32 to vector<8x1xf32>
    %258 = arith.divf %256, %257 : vector<8x1xf32>
    %cst_159 = arith.constant 9.99999974E-6 : f32
    %259 = vector.broadcast %cst_159 : f32 to vector<8x1xf32>
    %260 = arith.addf %258, %259 : vector<8x1xf32>
    %261 = math.rsqrt %260 : vector<8x1xf32>
    %262 = vector.broadcast %261 : vector<8x1xf32> to vector<8x32xf32>
    %263 = arith.mulf %253, %262 : vector<8x32xf32>
    %264 = vector.broadcast %245 : vector<1x32xf32> to vector<8x32xf32>
    %265 = arith.mulf %263, %264 : vector<8x32xf32>
    %266 = vector.broadcast %247 : vector<1x32xf32> to vector<8x32xf32>
    %267 = arith.addf %265, %266 : vector<8x32xf32>
    %268 = arith.truncf %267 : vector<8x32xf32> to vector<8x32xbf16>
    %c1_160 = arith.constant 1 : index
    %c0_161 = arith.constant 0 : index
    %c0_162 = arith.constant 0 : index
    %269 = vector.load %arg15[%c1_160, %c0_161, %c0_162] : memref<2x32x128xbf16, #tpu.memory_space<vmem>>, vector<1x32x128xbf16>
    %270 = vector.shape_cast %269 : vector<1x32x128xbf16> to vector<32x128xbf16>
    %cst_163 = arith.constant dense<0.000000e+00> : vector<8x128xf32>
    %271 = tpu.matmul %268, %270, %cst_163 {dimension_numbers = #tpu.dot_dimension_numbers<[1], [0], [0], [1], [0, 0, 1, 1], [], []>} : vector<8x32xbf16>, vector<32x128xbf16>, vector<8x128xf32> -> vector<8x128xf32>
    %c1_164 = arith.constant 1 : index
    %c0_165 = arith.constant 0 : index
    %c0_166 = arith.constant 0 : index
    %272 = vector.load %arg16[%c1_164, %c0_165, %c0_166] : memref<2x1x128xf32, #tpu.memory_space<vmem>>, vector<1x1x128xf32>
    %273 = vector.shape_cast %272 : vector<1x1x128xf32> to vector<1x128xf32>
    %274 = vector.broadcast %273 : vector<1x128xf32> to vector<8x128xf32>
    %275 = arith.addf %271, %274 : vector<8x128xf32>
    %cst_167 = arith.constant 1.702000e+00 : f32
    %276 = vector.broadcast %cst_167 : f32 to vector<8x128xf32>
    %277 = arith.mulf %276, %275 : vector<8x128xf32>
    %278 = arith.negf %277 : vector<8x128xf32>
    %279 = math.exp %278 : vector<8x128xf32>
    %cst_168 = arith.constant 1.000000e+00 : f32
    %280 = vector.broadcast %cst_168 : f32 to vector<8x128xf32>
    %281 = arith.addf %280, %279 : vector<8x128xf32>
    %282 = arith.divf %280, %281 : vector<8x128xf32>
    %283 = arith.mulf %275, %282 : vector<8x128xf32>
    %284 = arith.truncf %283 : vector<8x128xf32> to vector<8x128xbf16>
    %c1_169 = arith.constant 1 : index
    %c0_170 = arith.constant 0 : index
    %c0_171 = arith.constant 0 : index
    %285 = vector.load %arg17[%c1_169, %c0_170, %c0_171] : memref<2x128x32xbf16, #tpu.memory_space<vmem>>, vector<1x128x32xbf16>
    %286 = vector.shape_cast %285 : vector<1x128x32xbf16> to vector<128x32xbf16>
    %cst_172 = arith.constant dense<0.000000e+00> : vector<8x32xf32>
    %287 = tpu.matmul %284, %286, %cst_172 {dimension_numbers = #tpu.dot_dimension_numbers<[1], [0], [0], [1], [0, 0, 1, 1], [], []>} : vector<8x128xbf16>, vector<128x32xbf16>, vector<8x32xf32> -> vector<8x32xf32>
    %c1_173 = arith.constant 1 : index
    %c0_174 = arith.constant 0 : index
    %c0_175 = arith.constant 0 : index
    %288 = vector.load %arg18[%c1_173, %c0_174, %c0_175] : memref<2x1x32xf32, #tpu.memory_space<vmem>>, vector<1x1x32xf32>
    %289 = vector.shape_cast %288 : vector<1x1x32xf32> to vector<1x32xf32>
    %290 = vector.broadcast %289 : vector<1x32xf32> to vector<8x32xf32>
    %291 = arith.addf %287, %290 : vector<8x32xf32>
    %292 = arith.addf %243, %291 : vector<8x32xf32>
    %293 = vector.extract_strided_slice %292 {offsets = [0, 0], sizes = [1, 32], strides = [1, 1]} : vector<8x32xf32> to vector<1x32xf32>
    %c0_176 = arith.constant 0 : index
    %c0_177 = arith.constant 0 : index
    %294 = vector.load %arg20[%c0_176, %c0_177] : memref<1x32xf32, #tpu.memory_space<vmem>>, vector<1x32xf32>
    %c0_178 = arith.constant 0 : index
    %c0_179 = arith.constant 0 : index
    %295 = vector.load %arg21[%c0_178, %c0_179] : memref<1x32xf32, #tpu.memory_space<vmem>>, vector<1x32xf32>
    %cst_180 = arith.constant dense<0.000000e+00> : vector<1xf32>
    %296 = vector.multi_reduction <add>, %293, %cst_180 [1] : vector<1x32xf32> to vector<1xf32>
    %297 = vector.shape_cast %296 : vector<1xf32> to vector<1x1xf32>
    %cst_181 = arith.constant 3.200000e+01 : f32
    %298 = vector.broadcast %cst_181 : f32 to vector<1x1xf32>
    %299 = arith.divf %297, %298 : vector<1x1xf32>
    %300 = vector.broadcast %299 : vector<1x1xf32> to vector<1x32xf32>
    %301 = arith.subf %293, %300 : vector<1x32xf32>
    %302 = arith.mulf %301, %301 : vector<1x32xf32>
    %cst_182 = arith.constant dense<0.000000e+00> : vector<1xf32>
    %303 = vector.multi_reduction <add>, %302, %cst_182 [1] : vector<1x32xf32> to vector<1xf32>
    %304 = vector.shape_cast %303 : vector<1xf32> to vector<1x1xf32>
    %cst_183 = arith.constant 3.200000e+01 : f32
    %305 = vector.broadcast %cst_183 : f32 to vector<1x1xf32>
    %306 = arith.divf %304, %305 : vector<1x1xf32>
    %cst_184 = arith.constant 9.99999974E-6 : f32
    %307 = vector.broadcast %cst_184 : f32 to vector<1x1xf32>
    %308 = arith.addf %306, %307 : vector<1x1xf32>
    %309 = math.rsqrt %308 : vector<1x1xf32>
    %310 = vector.broadcast %309 : vector<1x1xf32> to vector<1x32xf32>
    %311 = arith.mulf %301, %310 : vector<1x32xf32>
    %312 = arith.mulf %311, %294 : vector<1x32xf32>
    %313 = arith.addf %312, %295 : vector<1x32xf32>
    %314 = arith.truncf %313 : vector<1x32xf32> to vector<1x32xbf16>
    %c0_185 = arith.constant 0 : index
    %c0_186 = arith.constant 0 : index
    %315 = vector.load %arg22[%c0_185, %c0_186] : memref<32x16xbf16, #tpu.memory_space<vmem>>, vector<32x16xbf16>
    %cst_187 = arith.constant dense<0.000000e+00> : vector<1x16xf32>
    %316 = tpu.matmul %314, %315, %cst_187 {dimension_numbers = #tpu.dot_dimension_numbers<[1], [0], [0], [1], [0, 0, 1, 1], [], []>} : vector<1x32xbf16>, vector<32x16xbf16>, vector<1x16xf32> -> vector<1x16xf32>
    %c0_188 = arith.constant 0 : index
    %c0_189 = arith.constant 0 : index
    %c0_190 = arith.constant 0 : index
    %317 = vector.load %arg23[%c0_188, %c0_189, %c0_190] : memref<1x1x16xf32, #tpu.memory_space<vmem>>, vector<1x1x16xf32>
    %318 = vector.shape_cast %317 : vector<1x1x16xf32> to vector<1x16xf32>
    %319 = vector.shape_cast %316 : vector<1x16xf32> to vector<1x1x16xf32>
    tpu.vector_store %arg23[%c0_188, %c0_189, %c0_190], %319 {strides = array<i32>} : memref<1x1x16xf32, #tpu.memory_space<vmem>>, vector<1x1x16xf32>,
    return
  }
  func.func @transform_0(%arg0: i32) -> (i32, i32, i32) {
    %c0_i32 = arith.constant 0 : i32
    %c0_i32_0 = arith.constant 0 : i32
    %c0_i32_1 = arith.constant 0 : i32
    return %arg0, %c0_i32, %c0_i32_0 : i32, i32, i32
  }
  func.func @transform_1(%arg0: i32) -> (i32, i32) {
    %c0_i32 = arith.constant 0 : i32
    %c0_i32_0 = arith.constant 0 : i32
    %c0_i32_1 = arith.constant 0 : i32
    return %c0_i32, %c0_i32_0 : i32, i32
  }
  func.func @transform_2(%arg0: i32) -> (i32, i32) {
    %c0_i32 = arith.constant 0 : i32
    %c0_i32_0 = arith.constant 0 : i32
    %c0_i32_1 = arith.constant 0 : i32
    return %c0_i32, %c0_i32_0 : i32, i32
  }
  func.func @transform_3(%arg0: i32) -> (i32, i32, i32) {
    %c0_i32 = arith.constant 0 : i32
    %c0_i32_0 = arith.constant 0 : i32
    %c0_i32_1 = arith.constant 0 : i32
    %c0_i32_2 = arith.constant 0 : i32
    return %c0_i32, %c0_i32_0, %c0_i32_1 : i32, i32, i32
  }
  func.func @transform_4(%arg0: i32) -> (i32, i32) {
    %c0_i32 = arith.constant 0 : i32
    %c0_i32_0 = arith.constant 0 : i32
    %c0_i32_1 = arith.constant 0 : i32
    return %c0_i32, %c0_i32_0 : i32, i32
  }
  func.func @transform_5(%arg0: i32) -> (i32, i32) {
    %c0_i32 = arith.constant 0 : i32
    %c0_i32_0 = arith.constant 0 : i32
    %c0_i32_1 = arith.constant 0 : i32
    return %c0_i32, %c0_i32_0 : i32, i32
  }
  func.func @transform_6(%arg0: i32) -> (i32, i32, i32) {
    %c0_i32 = arith.constant 0 : i32
    %c0_i32_0 = arith.constant 0 : i32
    %c0_i32_1 = arith.constant 0 : i32
    %c0_i32_2 = arith.constant 0 : i32
    return %c0_i32, %c0_i32_0, %c0_i32_1 : i32, i32, i32
  }
  func.func @transform_7(%arg0: i32) -> (i32, i32, i32) {
    %c0_i32 = arith.constant 0 : i32
    %c0_i32_0 = arith.constant 0 : i32
    %c0_i32_1 = arith.constant 0 : i32
    %c0_i32_2 = arith.constant 0 : i32
    return %c0_i32, %c0_i32_0, %c0_i32_1 : i32, i32, i32
  }
  func.func @transform_8(%arg0: i32) -> (i32, i32, i32, i32) {
    %c0_i32 = arith.constant 0 : i32
    %c0_i32_0 = arith.constant 0 : i32
    %c0_i32_1 = arith.constant 0 : i32
    %c0_i32_2 = arith.constant 0 : i32
    %c0_i32_3 = arith.constant 0 : i32
    return %c0_i32, %c0_i32_0, %c0_i32_1, %c0_i32_2 : i32, i32, i32, i32
  }
  func.func @transform_9(%arg0: i32) -> (i32, i32, i32, i32) {
    %c0_i32 = arith.constant 0 : i32
    %c0_i32_0 = arith.constant 0 : i32
    %c0_i32_1 = arith.constant 0 : i32
    %c0_i32_2 = arith.constant 0 : i32
    %c0_i32_3 = arith.constant 0 : i32
    return %c0_i32, %c0_i32_0, %c0_i32_1, %c0_i32_2 : i32, i32, i32, i32
  }
  func.func @transform_10(%arg0: i32) -> (i32, i32, i32) {
    %c0_i32 = arith.constant 0 : i32
    %c0_i32_0 = arith.constant 0 : i32
    %c0_i32_1 = arith.constant 0 : i32
    %c0_i32_2 = arith.constant 0 : i32
    return %c0_i32, %c0_i32_0, %c0_i32_1 : i32, i32, i32
  }
  func.func @transform_11(%arg0: i32) -> (i32, i32, i32) {
    %c0_i32 = arith.constant 0 : i32
    %c0_i32_0 = arith.constant 0 : i32
    %c0_i32_1 = arith.constant 0 : i32
    %c0_i32_2 = arith.constant 0 : i32
    return %c0_i32, %c0_i32_0, %c0_i32_1 : i32, i32, i32
  }
  func.func @transform_12(%arg0: i32) -> (i32, i32, i32) {
    %c0_i32 = arith.constant 0 : i32
    %c0_i32_0 = arith.constant 0 : i32
    %c0_i32_1 = arith.constant 0 : i32
    %c0_i32_2 = arith.constant 0 : i32
    return %c0_i32, %c0_i32_0, %c0_i32_1 : i32, i32, i32
  }
  func.func @transform_13(%arg0: i32) -> (i32, i32, i32) {
    %c0_i32 = arith.constant 0 : i32
    %c0_i32_0 = arith.constant 0 : i32
    %c0_i32_1 = arith.constant 0 : i32
    %c0_i32_2 = arith.constant 0 : i32
    return %c0_i32, %c0_i32_0, %c0_i32_1 : i32, i32, i32
  }
  func.func @transform_14(%arg0: i32) -> (i32, i32, i32) {
    %c0_i32 = arith.constant 0 : i32
    %c0_i32_0 = arith.constant 0 : i32
    %c0_i32_1 = arith.constant 0 : i32
    %c0_i32_2 = arith.constant 0 : i32
    return %c0_i32, %c0_i32_0, %c0_i32_1 : i32, i32, i32
  }
  func.func @transform_15(%arg0: i32) -> (i32, i32, i32) {
    %c0_i32 = arith.constant 0 : i32
    %c0_i32_0 = arith.constant 0 : i32
    %c0_i32_1 = arith.constant 0 : i32
    %c0_i32_2 = arith.constant 0 : i32
    return %c0_i32, %c0_i32_0, %c0_i32_1 : i32, i32, i32
  }
  func.func @transform_16(%arg0: i32) -> (i32, i32, i32) {
    %c0_i32 = arith.constant 0 : i32
    %c0_i32_0 = arith.constant 0 : i32
    %c0_i32_1 = arith.constant 0 : i32
    %c0_i32_2 = arith.constant 0 : i32
    return %c0_i32, %c0_i32_0, %c0_i32_1 : i32, i32, i32
  }
  func.func @transform_17(%arg0: i32) -> (i32, i32, i32) {
    %c0_i32 = arith.constant 0 : i32
    %c0_i32_0 = arith.constant 0 : i32
    %c0_i32_1 = arith.constant 0 : i32
    %c0_i32_2 = arith.constant 0 : i32
    return %c0_i32, %c0_i32_0, %c0_i32_1 : i32, i32, i32
  }
  func.func @transform_18(%arg0: i32) -> (i32, i32, i32) {
    %c0_i32 = arith.constant 0 : i32
    %c0_i32_0 = arith.constant 0 : i32
    %c0_i32_1 = arith.constant 0 : i32
    %c0_i32_2 = arith.constant 0 : i32
    return %c0_i32, %c0_i32_0, %c0_i32_1 : i32, i32, i32
  }
  func.func @transform_19(%arg0: i32) -> (i32, i32) {
    %c0_i32 = arith.constant 0 : i32
    %c0_i32_0 = arith.constant 0 : i32
    %c0_i32_1 = arith.constant 0 : i32
    return %c0_i32, %c0_i32_0 : i32, i32
  }
  func.func @transform_20(%arg0: i32) -> (i32, i32) {
    %c0_i32 = arith.constant 0 : i32
    %c0_i32_0 = arith.constant 0 : i32
    %c0_i32_1 = arith.constant 0 : i32
    return %c0_i32, %c0_i32_0 : i32, i32
  }
  func.func @transform_21(%arg0: i32) -> (i32, i32) {
    %c0_i32 = arith.constant 0 : i32
    %c0_i32_0 = arith.constant 0 : i32
    %c0_i32_1 = arith.constant 0 : i32
    return %c0_i32, %c0_i32_0 : i32, i32
  }
  func.func @transform_22(%arg0: i32) -> (i32, i32, i32) {
    %c0_i32 = arith.constant 0 : i32
    %c0_i32_0 = arith.constant 0 : i32
    %c0_i32_1 = arith.constant 0 : i32
    return %arg0, %c0_i32, %c0_i32_0 : i32, i32, i32
  }
}

</mosaic_0001>

<bundles_post_ra>
// kernel: clip_encode_image.1
= control target key start
LH: loop header
LB: loop body
LE: loop exit
PB: predicated region body
PF: predicated region fallthrough
CT: control target
= control target key end

     0   :  { %s6109_s0 = inlined_call_operand.vmem [shape: bf16[2,8,192], index: 0, kind: input, shape index: {}]   ;;  %s6110_s1 = inlined_call_operand.vmem [shape: bf16[192,32], index: 1, kind: input, shape index: {}]   ;;  %s6111_s2 = inlined_call_operand.vmem [shape: f32[8,32], index: 2, kind: input, shape index: {}]   ;;  %s6112_s3 = inlined_call_operand.vmem [shape: f32[1,1,8], index: 3, kind: input, shape index: {}]   ;;  %s6113_s4 = inlined_call_operand.vmem [shape: f32[1,32], index: 4, kind: input, shape index: {}]   ;;  %s6114_s5 = inlined_call_operand.vmem [shape: f32[1,32], index: 5, kind: input, shape index: {}]   ;;  %s6115_s6 = inlined_call_operand.vmem [shape: f32[2,1,32], index: 6, kind: input, shape index: {}]   ;;  %s6116_s7 = inlined_call_operand.vmem [shape: f32[2,1,32], index: 7, kind: input, shape index: {}]   ;;  %s6117_s8 = inlined_call_operand.vmem [shape: bf16[2,3,32,32], index: 8, kind: input, shape index: {}]   ;;  %s6118_s9 = inlined_call_operand.vmem [shape: f32[2,3,1,32], index: 9, kind: input, shape index: {}]   ;;  %s6119_s10 = inlined_call_operand.vmem [shape: bf16[2,32,32], index: 10, kind: input, shape index: {}]   ;;  %s6120_s11 = inlined_call_operand.vmem [shape: f32[2,1,32], index: 11, kind: input, shape index: {}]   ;;  %s6121_s12 = inlined_call_operand.vmem [shape: f32[2,1,32], index: 12, kind: input, shape index: {}]   ;;  %s6122_s13 = inlined_call_operand.vmem [shape: f32[2,1,32], index: 13, kind: input, shape index: {}]   ;;  %s6123_s14 = inlined_call_operand.vmem [shape: bf16[2,32,128], index: 14, kind: input, shape index: {}]   ;;  %s6124_s15 = inlined_call_operand.vmem [shape: f32[2,1,128], index: 15, kind: input, shape index: {}]   ;;  %s6125_s16 = inlined_call_operand.vmem [shape: bf16[2,128,32], index: 16, kind: input, shape index: {}]   ;;  %s6126_s17 = inlined_call_operand.vmem [shape: f32[2,1,32], index: 17, kind: input, shape index: {}]   ;;  %s6127_s18 = inlined_call_operand.vmem [shape: f32[2,1,32], index: 18, kind: input, shape index: {}]   ;;  %s6128_s19 = inlined_call_operand.vmem [shape: f32[1,32], index: 19, kind: input, shape index: {}]   ;;  %s6129_s20 = inlined_call_operand.vmem [shape: f32[1,32], index: 20, kind: input, shape index: {}]   ;;  %s6130_s21 = inlined_call_operand.vmem [shape: bf16[32,16], index: 21, kind: input, shape index: {}]   ;;  %s6131_s22 = inlined_call_operand.hbm [shape: f32[2,1,16], index: 22, kind: output, shape index: {}]  }
   0x1   :  { %6144 = sst [smem:[#allocation11_spill]] %s6109_s0 }
   0x2   :  { %6145 = sst [smem:[#allocation12_spill]] %s6110_s1 }
   0x3   :  { %6146 = sst [smem:[#allocation13_spill]] %s6111_s2 }
   0x4   :  { %6147 = sst [smem:[#allocation14_spill]] %s6112_s3 }
   0x5   :  { %6148 = sst [smem:[#allocation15_spill]] %s6113_s4 }
   0x6   :  { %6149 = sst [smem:[#allocation16_spill]] %s6114_s5 }
   0x7   :  { %6150 = sst [smem:[#allocation17_spill]] %s6115_s6 }
   0x8   :  { %6151 = sst [smem:[#allocation18_spill]] %s6131_s22 }
   0x9   :  { %27 = vsyncpa [#allocation3], 0 }
   0xa   :  { %29 = vsyncpa [#allocation3 + $0x1], 0  ;;  %s5380_s3 = smov 0   ;;  %s5382_s28 = smov 0  }
   0xb   :  { %s5384_s29 = smov 0   ;;  %s5386_s30 = smov 0  }
   0xc LB: > { %6152 = sst [smem:[#allocation5_spill]] %s5239_s3  ;;  %s5401_s4 = sadd.s32 4294967295, %s5251_s30   ;;  %s5251_s30 = sphi %s5386_s30, %s6174_s30   ;;  %s5247_s29 = sphi %s5384_s29, %s6176_s29   ;;  %s5243_s28 = sphi %s5382_s28, %s6178_s28   ;;  %s5239_s3 = sphi %s5380_s3, %s6177_s3  }
   0xd   : > { %6153 = sst [smem:[#allocation6_spill]] %s5247_s29  ;;  %s4546_s0 = sadd.s32 4294967294, %s5251_s30  }
   0xe   : > { %6154 = sst [smem:[#allocation7_spill]] %s5251_s30  ;;  %s5405_s23 = sadd.s32 1, %s5251_s30  }
   0xf   : > { %6155 = sst [smem:[#allocation8_spill]] %s5405_s23  ;;  %s509_s1 = sadd.s32 1, %s5247_s29 }
  0x10   : > { %s506_s5 = ssub.s32 %s5251_s30, %s5405_s23  ;;  %p519_p0 = scmp.ne.s32.totalorder %s5247_s29, %s5243_s28 }
  0x11   : > { %p507_p1 = scmp.eq.s32.totalorder %s506_s5, 0  ;;  %p520_p2 = scmp.eq.s32.totalorder %s5401_s4, 1 }
  0x12   : > { %p525_p3 = scmp.ne.s32.totalorder %s5243_s28, %s5239_s3  ;;  %p526_p4 = scmp.eq.s32.totalorder %s4546_s0, 1 }
  0x13   : > { %s5416_s24 = scalar_select %p507_p1, %s5247_s29, %s509_s1  }
  0x14   : > { %p5418_p5 = por %p520_p2, %p519_p0  ;;  %p5422_p6 = por %p526_p4, %p525_p3 }
  0x15   : > { %6156 = sst [smem:[#allocation9_spill]] %s5416_s24  ;;  %p4549_p7 = scmp.ge.s32.totalorder %s5251_s30, 1 }
  0x16   : > { %s6158_s25 = scalar_select %p5422_p6, 1, 0 }
  0x17   : > { %p615_p8 = scmp.lt.s32.totalorder %s5251_s30, 3 }
  0x18   : > { %6159 = sst [smem:[#allocation10_spill]] %s6158_s25 }
  0x19   : > { %p616_p9 = pnand %p4549_p7, %p615_p8 }
  0x1a   : > { %s6160_s27 = sld [smem:[#allocation12_spill]] (!%p616_p9)  ;;  %v5253_v1 = vmov (!%p616_p9), 0   ;;  %p676_p10 = scmp.lt.s32.totalorder (!%p616_p9), %s5401_s4, 1  ;;  %vm786_vm0 = vcmask (!%p616_p9), 523264   ;;  %vm832_vm1 = vcmask (!%p616_p9), 261120   ;;  %v5099_v43 = vld [vmem:[%s6117_s8] sm:$0xff] (!%p616_p9)  }
  0x1b   : > { %619 = sbr.rel (%p616_p9) target bundleno = 6333 (0x18bd), region = 108  ;;  %790 = vmatprep.subr.bf16.mxu0 (!%p616_p9), %v5253_v1  ;;  %s6161_s25 = sld [smem:[#allocation11_spill]] (!%p616_p9)  ;;  %v5254_v44 = vmov (!%p616_p9), 0.0   ;;  %vm5255_vm2 = vmmov (!%p616_p9), 0   ;;  %v5100_v45 = vld [vmem:[%s6117_s8 + $0x8] sm:$0xff] (!%p616_p9)   ;;  %v5101_v55 = vld [vmem:[%s6117_s8 + $0x10] sm:$0xff] (!%p616_p9)  }
  0x1c   : > { %s6162_s30 = sld [smem:[#allocation13_spill]] (!%p616_p9)  ;;  %s6164_s0 = sld [smem:[#allocation16_spill]] (!%p616_p9)  ;;  %4827 = vmatprep.subr.bf16.mxu1 (!%p616_p9), %v5254_v44  ;;  %4831 = vmatprep.mubr.msk.bf16.mxu1 (!%p616_p9), %vm5255_vm2, %v5254_v44  ;;  %v4570_v52 = vld [vmem:[%s6116_s7] ss:$0 sm:$0xff] (!%p616_p9)  ;;  %v5102_v57 = vld [vmem:[%s6117_s8 + $0x18] sm:$0xff] (!%p616_p9)   ;;  %v5104_v59 = vld [vmem:[%s6117_s8 + $0x28] sm:$0xff] (!%p616_p9)  }
  0x1d   : > { %4828 = vmatpush3.bf16.msra.mxu1 (!%p616_p9), %v5099_v43  ;;  %v5103_v58 = vld [vmem:[%s6117_s8 + $0x20] sm:$0xff] (!%p616_p9)   ;;  %s5258_s1 = smov (!%p616_p9), 104   ;;  %vm1534_vm3 = vcmask (!%p616_p9), 64512   ;;  %s6143_s22 = smov (!%p616_p9), 16   ;;  %vm2338_vm4 = vcmask (!%p616_p9), 130048   ;;  %vm2340_vm5 = vcmask (!%p616_p9), 195584  }
  0x1e   : > { %4829 = vmatprep.subr.bf16.mxu1 (!%p616_p9), %v5254_v44  ;;  %v4571_v60 = vld [vmem:[%s6118_s9] ss:$0 sm:$0xff] (!%p616_p9)  ;;  %s6168_s26 = smov (!%p616_p9), 8   ;;  %vm4400_vm6 = vcmask (!%p616_p9), 253952   ;;  %vm4476_vm7 = vcmask (!%p616_p9), 122880   ;;  %s6170_s2 = sld [smem:[#allocation18_spill]] (!%p616_p9) }
  0x20   : > { %v5085_v0 = vld [vmem:[%s6160_s27] sm:$0xff] (!%p616_p9)   ;;  %v5086_v2 = vld [vmem:[%s6160_s27 + $0x8] sm:$0xff] (!%p616_p9)   ;;  %v5087_v3 = vld [vmem:[%s6160_s27 + $0x10] sm:$0xff] (!%p616_p9)  }
  0x21   : > { %791 = vmatpush1.bf16.msra.mxu0 (!%p616_p9), %v5085_v0  ;;  %v5088_v4 = vld [vmem:[%s6160_s27 + $0x18] sm:$0xff] (!%p616_p9)   ;;  %v5089_v5 = vld [vmem:[%s6160_s27 + $0x20] sm:$0xff] (!%p616_p9)   ;;  %v5090_v8 = vld [vmem:[%s6160_s27 + $0x28] sm:$0xff] (!%p616_p9)   ;;  %4830 = vmatpush3.bf16.msra.mxu1 (!%p616_p9), %v5100_v45 }
  0x22   : > { %792 = vmatprep.subr.bf16.mxu0 %v5253_v1  ;;  %s677_s5 = scalar_select %p676_p10, %s5401_s4, 1  ;;  %v5091_v9 = vld [vmem:[%s6160_s27 + $0x30] sm:$0xff]   ;;  %v5092_v10 = vld [vmem:[%s6160_s27 + $0x38] sm:$0xff]   ;;  %v5093_v11 = vld [vmem:[%s6160_s27 + $0x40] sm:$0xff]   ;;  %4835 = vmatprep.subr.bf16.mxu1 %v5254_v44 }
  0x23   : > { %v5094_v12 = vld [vmem:[%s6160_s27 + $0x48] sm:$0xff]   ;;  %v5095_v13 = vld [vmem:[%s6160_s27 + $0x50] sm:$0xff]   ;;  %v5096_v14 = vld [vmem:[%s6160_s27 + $0x58] sm:$0xff]  }
  0x24   : > { %s4743_s23 = sshll.u32 %s677_s5, 3  ;;  %v707_v16 = vld [vmem:[%s6162_s30] sm:$0xff]  ;;  %s6163_s5 = sld [smem:[#allocation15_spill]] }
  0x25   : > { %793 = vmatpush1.bf16.msra.mxu0 %v5086_v2  ;;  %s680_s3 = scalar_lea.vmem %s6161_s25, %s4743_s23  ;;  %v4568_v34 = vld [vmem:[%s6164_s0] ss:$0 sm:$0xff]  ;;  %s6165_s25 = sld [smem:[#allocation17_spill]]  ;;  %v4580_v2 = vld [vmem:[%s6118_s9 + $0x1] ss:$0 sm:$0xff] }
  0x26   : > { %794 = vmatprep.subr.bf16.mxu0 %v5253_v1  ;;  %v682_v6 = vld [vmem:[%s680_s3] sm:$0xff]  ;;  %s5257_s0 = smov 112   ;;  %s6166_s23 = sld [smem:[#allocation14_spill]] }
  0x27   : > { %v4553_v7 = vcombine.high %v682_v6, %v682_v6  ;;  %v4552_v15 = vcombine.low %v682_v6, %v682_v6  ;;  %s6142_s30 = smov 8   ;;  %s6141_s3 = smov 24  }
  0x29   : > { %795 = vmatpush1.bf16.msra.mxu0 %v5087_v3  ;;  %4566 = vmatprep.mubr.msk.bf16.mxu0 %vm786_vm0, %v4553_v7 }
  0x2a   : > { %796 = vmatprep.subr.bf16.mxu0 %v5253_v1  ;;  %v4567_v32 = vld [vmem:[%s6163_s5] ss:$0 sm:$0xff]  ;;  %s5256_s5 = smov 120  }
  0x2b   : > { %v4569_v50 = vld [vmem:[%s6165_s25] ss:$0 sm:$0xff] }
  0x2d   : > { %797 = vmatpush1.bf16.msra.mxu0 %v5088_v4 }
  0x2e   : > { %798 = vmatprep.subr.bf16.mxu0 %v5253_v1 }
  0x31   : > { %799 = vmatpush1.bf16.msra.mxu0 %v5089_v5 }
  0x32   : > { %800 = vmatprep.subr.bf16.mxu0 %v5253_v1 }
  0x35   : > { %801 = vmatpush1.bf16.msra.mxu0 %v5090_v8 }
  0x36   : > { %802 = vmatprep.subr.bf16.mxu0 %v5253_v1 }
  0x39   : > { %803 = vmatpush1.bf16.msra.mxu0 %v5091_v9 }
  0x3a   : > { %804 = vmatprep.subr.bf16.mxu0 %v5253_v1 }
  0x3d   : > { %805 = vmatpush1.bf16.msra.mxu0 %v5092_v10 }
  0x3e   : > { %806 = vmatprep.subr.bf16.mxu0 %v5253_v1 }
  0x41   : > { %807 = vmatpush1.bf16.msra.mxu0 %v5093_v11 }
  0x42   : > { %808 = vmatprep.subr.bf16.mxu0 %v5253_v1 }
  0x45   : > { %809 = vmatpush1.bf16.msra.mxu0 %v5094_v12  ;;  %v5259_v12 = vmov 1983009808  }
  0x46   : > { %810 = vmatprep.subr.bf16.mxu0 %v5253_v1 }
  0x49   : > { %811 = vmatpush1.bf16.msra.mxu0 %v5095_v13  ;;  %v1109_v13 = vunpack.c.l.s4 %v5259_v12 }
  0x4a   : > { %812 = vmatprep.subr.bf16.mxu0 %v5253_v1 }
  0x4d   : > { %813 = vmatpush1.bf16.msra.mxu0 %v5096_v14  ;;  %v1111_v14 = vlaneseq }
  0x4e   : > { %4907 = vmatprep.subr.bf16.mxu0 %v5254_v44 }
  0x50   : > { %823 = vmatmul.mubr.bf16.vlgmr.msra.gmra.mrb[0].mxu0 %v4552_v15 }
  0x51   : > { %4923 = vmatprep.mubr.msk.bf16.mxu0 %vm5255_vm2, %v5254_v44 }
 0x123   : > { %v824_v17 = vpop.f32.mrb[0].mxu0 }
 0x124   : > { %v825_v18 = vadd.f32 %v824_v17, %v707_v16  ;;  %v826_v19 = vpop.f32.mrb[1].mxu0  ;;  %v5260_v16 = vmov 1934713408  }
 0x125   : > { %v827_v20 = vpop.f32.mrb[2].mxu0  ;;  %v1141_v17 = vunpack.c.l.s4 %v5260_v16  ;;  %v1112_v19 = vshrl.u32 %v1111_v14, 7 }
 0x126   : > { %v828_v21 = vpop.f32.mrb[3].mxu0  ;;  %v833_v22 = vsel %vm832_vm1, %v825_v18, 0.0 }
 0x127   : > { %834 = vadd.xlane.f32.xlu0 %v833_v22  ;;  %v1142_v22 = vunpack.c.0.s8 %v1141_v17 }
 0x1b4   : > { %v835_v23 = vpop.xlane.xlu0 %834 }
 0x1b5   : > { %v837_v24 = vmul.f32 0.03125, %v835_v23 }
 0x1b7   : > { %v838_v25 = vsub.f32 %v825_v18, %v837_v24  ;;  %v1110_v18 = vunpack.c.0.s8 %v1109_v13 }
 0x1b9   : > { %v839_v26 = vmul.f32 %v838_v25, %v838_v25  ;;  %v5545_v23 = vsub.s32 %v1110_v18, %v1112_v19 }
 0x1bb   : > { %v840_v27 = vsel %vm832_vm1, %v839_v26, 0.0 }
 0x1bc   : > { %841 = vadd.xlane.f32.xlu0 %v840_v27 }
 0x249   : > { %v842_v28 = vpop.xlane.xlu0 %841 }
 0x24a   : > { %v843_v29 = vmul.f32 0.03125, %v842_v28 }
 0x24c   : > { %v844_v30 = vadd.f32 1e-05, %v843_v29 }
 0x24e   : > { %5137 = vrsqrt.f32 %v844_v30  ;;  %v5547_v30 = vsub.s32 %v1142_v22, %v1112_v19 }
 0x258   : > { %v5138_v31 = vpop.eup %5137 }
 0x259   : > { %v846_v33 = vmul.f32 %v5138_v31, %v838_v25 }
 0x25b   : > { %v853_v35 = vmul.f32 %v4567_v32, %v846_v33 }
 0x25d   : > { %v5480_v36 = vadd.f32 %v4568_v34, %v853_v35 }
 0x25f   : > { %v864_v37 = vsel %vm832_vm1, %v5480_v36, 0.0 }
 0x260   : > { %865 = vadd.xlane.f32.xlu1 %v864_v37 }
 0x2ed   : > { %v866_v38 = vpop.xlane.xlu1 %865 }
 0x2ee   : > { %v867_v39 = vmul.f32 0.03125, %v866_v38 }
 0x2f0   : > { %v868_v40 = vsub.f32 %v5480_v36, %v867_v39 }
 0x2f2   : > { %v869_v41 = vmul.f32 %v868_v40, %v868_v40 }
 0x2f4   : > { %v870_v42 = vsel %vm832_vm1, %v869_v41, 0.0 }
 0x2f5   : > { %871 = vadd.xlane.f32.xlu1 %v870_v42 }
 0x382   : > { %v872_v46 = vpop.xlane.xlu1 %871 }
 0x383   : > { %v873_v47 = vmul.f32 0.03125, %v872_v46 }
 0x385   : > { %v874_v48 = vadd.f32 1e-05, %v873_v47 }
 0x387   : > { %5139 = vrsqrt.f32 %v874_v48 }
 0x391   : > { %v5140_v49 = vpop.eup %5139 }
 0x392   : > { %v876_v51 = vmul.f32 %v5140_v49, %v868_v40 }
 0x394   : > { %v883_v53 = vmul.f32 %v4569_v50, %v876_v51 }
 0x396   : > { %v890_v54 = vadd.f32 %v4570_v52, %v883_v53 }
 0x398   : > { %v891_v56 = vpack.c.bf16 %v890_v54, %v890_v54 }
 0x39a   : > { %4832 = vmatmul.mubr.msk.bf16.vlgmr.msra.gmra.mrb[0].mxu1 %vm832_vm1, %v891_v56 }
 0x39b   : > { %4836 = vmatpush3.bf16.msra.mxu1 %v5101_v55  ;;  %4839 = vmatprep.mubr.msk.bf16.mxu1 %vm5255_vm2, %v5254_v44 }
 0x39c   : > { %4837 = vmatprep.subr.bf16.mxu1 %v5254_v44 }
 0x39f   : > { %4838 = vmatpush3.bf16.msra.mxu1 %v5102_v57 }
 0x3a0   : > { %4843 = vmatprep.subr.bf16.mxu1 %v5254_v44 }
 0x3a2   : > { %4840 = vmatmul.mubr.msk.bf16.vlgmr.msra.gmra.mrb[4].mxu1 %vm832_vm1, %v891_v56 }
 0x3a3   : > { %4844 = vmatpush3.bf16.msra.mxu1 %v5103_v58  ;;  %4847 = vmatprep.mubr.msk.bf16.mxu1 %vm5255_vm2, %v5254_v44 }
 0x3a4   : > { %4845 = vmatprep.subr.bf16.mxu1 %v5254_v44 }
 0x3a7   : > { %4846 = vmatpush3.bf16.msra.mxu1 %v5104_v59 }
 0x3a8   : > { %4851 = vmatprep.subr.mxu1 %v5254_v44 }
 0x3aa   : > { %4848 = vmatmul.mubr.msk.bf16.vlgmr.msra.gmra.mrb[8].mxu1 %vm832_vm1, %v891_v56 }
 0x3ab   : > { %4853 = vmatprep.mubr.msk.f32.mxu1 %vm5255_vm2, %v5254_v44 }
 0x46d   : > { %v952_v61 = vpop.f32.mrb[0].mxu1 }
 0x46e   : > { %v953_v62 = vadd.f32 %v4571_v60, %v952_v61  ;;  %v4833_v63 = vpop.f32.mrb[1].mxu1 }
 0x46f   : > { %v955_v0 = vpop.f32.mrb[2].mxu1 }
 0x470   : > { %1097 = vrot.lane.b32.xlu1 %v953_v62, %s5256_s5  ;;  %v4834_v1 = vpop.f32.mrb[3].mxu1 }
 0x475   : > { %v1017_v3 = vpop.f32.mrb[4].mxu1 }
 0x476   : > { %v1018_v4 = vadd.f32 %v4580_v2, %v1017_v3  ;;  %v4841_v5 = vpop.f32.mrb[5].mxu1 }
 0x477   : > { %v1020_v6 = vpop.f32.mrb[6].mxu1 }
 0x478   : > { %1246 = vrot.lane.b32.xlu1 %v1018_v4, %s5257_s0  ;;  %1243 = vrot.lane.b32.xlu0 %v1018_v4, %s5256_s5  ;;  %v4842_v7 = vpop.f32.mrb[7].mxu1 }
 0x47c   : > { %1249 = vrot.lane.b32.xlu1 %v1018_v4, %s5258_s1  ;;  %1100 = vrot.lane.b32.xlu0 %v953_v62, %s5257_s0 }
 0x47d   : > { %v5542_v8 = vpop.f32.mrb[8].mxu1 }
 0x47e   : > { %v4849_v9 = vpop.f32.mrb[9].mxu1 }
 0x47f   : > { %v1085_v10 = vpop.f32.mrb[10].mxu1 }
 0x480   : > { %1103 = vrot.lane.b32.xlu1 %v953_v62, %s5258_s1  ;;  %v4850_v11 = vpop.f32.mrb[11].mxu1 }
 0x4e2   : > { %v1098_v15 = vpop.permute.xlu1 %1097 }
 0x4ea   : > { %v1247_v20 = vpop.permute.xlu1 %1246  ;;  %v1244_v21 = vpop.permute.xlu0 %1243 }
 0x4eb   : > { %v1252_v24 = vcombine.low %v1018_v4, %v1247_v20  ;;  %v1253_v25 = vcombine.high %v1018_v4, %v1247_v20 }
 0x4ed   : > { %v1260_v31 = vrot.slane %v1252_v24, %v5545_v23  ;;  %v1267_v32 = vrot.slane %v1253_v25, %v5545_v23 }
 0x4ee   : > { %v1250_v26 = vpop.permute.xlu1 %1249  ;;  %v1101_v29 = vpop.permute.xlu0 %1100 }
 0x4ef   : > { %v1268_v27 = vcombine.low %v1244_v21, %v1250_v26  ;;  %v1269_v28 = vcombine.high %v1244_v21, %v1250_v26  ;;  %v1106_v35 = vcombine.low %v953_v62, %v1101_v29  ;;  %v1107_v37 = vcombine.high %v953_v62, %v1101_v29 }
 0x4f1   : > { %v1276_v33 = vrot.slane %v1268_v27, %v5545_v23  ;;  %v1283_v34 = vrot.slane %v1269_v28, %v5545_v23  ;;  %v1114_v50 = vrot.slane %v1106_v35, %v5545_v23  ;;  %v1121_v51 = vrot.slane %v1107_v37, %v5545_v23 }
 0x4f2   : > { %v1104_v38 = vpop.permute.xlu1 %1103 }
 0x4f3   : > { %v1284_v39 = vcombine.low %v1260_v31, %v1276_v33  ;;  %v1285_v40 = vcombine.high %v1260_v31, %v1276_v33  ;;  %v1300_v41 = vcombine.low %v1267_v32, %v1283_v34  ;;  %v1301_v42 = vcombine.high %v1267_v32, %v1283_v34 }
 0x4f4   : > { %v1122_v43 = vcombine.low %v1098_v15, %v1104_v38  ;;  %v1123_v45 = vcombine.high %v1098_v15, %v1104_v38 }
 0x4f5   : > { %v1292_v46 = vrot.slane %v1284_v39, %v5547_v30  ;;  %v1299_v47 = vrot.slane %v1285_v40, %v5547_v30  ;;  %v1308_v48 = vrot.slane %v1300_v41, %v5547_v30  ;;  %v1315_v49 = vrot.slane %v1301_v42, %v5547_v30 }
 0x4f6   : > { %v1130_v52 = vrot.slane %v1122_v43, %v5545_v23  ;;  %v1137_v53 = vrot.slane %v1123_v45, %v5545_v23  ;;  %v5604_v43 = vld [vmem:[%s6166_s23] ss:$0 sm:$0xff]  ;;  %s6167_s23 = smov 16  }
 0x4f7   : > { %v1320_v54 = vcombine.low %v1292_v46, %v1299_v47  ;;  %v4596_v55 = vcombine.high %v1292_v46, %v1299_v47  ;;  %v1336_v56 = vcombine.low %v1308_v48, %v1315_v49  ;;  %v4597_v57 = vcombine.high %v1308_v48, %v1315_v49 }
 0x4f8   : > { %v1138_v58 = vcombine.low %v1114_v50, %v1130_v52  ;;  %v1139_v59 = vcombine.high %v1114_v50, %v1130_v52  ;;  %v1154_v60 = vcombine.low %v1121_v51, %v1137_v53  ;;  %v1155_v61 = vcombine.high %v1121_v51, %v1137_v53 }
 0x4f9   : > { %v1327_v62 = vrot.slane %v1320_v54, %v5545_v23  ;;  %v1335_v63 = vrot.slane %v4596_v55, %v5545_v23  ;;  %v1343_v0 = vrot.slane %v1336_v56, %v5545_v23  ;;  %v1351_v1 = vrot.slane %v4597_v57, %v5545_v23 }
 0x4fa   : > { %v1146_v2 = vrot.slane %v1138_v58, %v5547_v30  ;;  %v1153_v3 = vrot.slane %v1139_v59, %v5547_v30  ;;  %v1162_v4 = vrot.slane %v1154_v60, %v5547_v30  ;;  %v1169_v5 = vrot.slane %v1155_v61, %v5547_v30 }
 0x4fb   : > { %v1352_v6 = vcombine.low %v1327_v62, %v1335_v63  ;;  %v1368_v7 = vcombine.low %v1343_v0, %v1351_v1  ;;  %v1353_v22 = vcombine.high %v1327_v62, %v1335_v63  ;;  %v1369_v24 = vcombine.high %v1343_v0, %v1351_v1  ;;  %v4589_v0 = vld [vmem:[%s6118_s9 + $0x2] ss:$0 sm:$0xff] }
 0x4fc   : > { %v1174_v9 = vcombine.low %v1146_v2, %v1153_v3  ;;  %v4594_v10 = vcombine.high %v1146_v2, %v1153_v3  ;;  %v1190_v11 = vcombine.low %v1162_v4, %v1169_v5  ;;  %v4595_v12 = vcombine.high %v1162_v4, %v1169_v5  ;;  %v4593_v2 = vld [vmem:[%s6127_s18] ss:$0 sm:$0xff] }
 0x4fd   : > { %v1360_v13 = vrot.slane %v1352_v6, %v5547_v30  ;;  %v1376_v14 = vrot.slane %v1368_v7, %v5547_v30  ;;  %v1367_v32 = vrot.slane %v1353_v22, %v5547_v30  ;;  %v1383_v33 = vrot.slane %v1369_v24, %v5547_v30 }
 0x4fe   : > { %v1181_v15 = vrot.slane %v1174_v9, %v5545_v23  ;;  %v1189_v16 = vrot.slane %v4594_v10, %v5545_v23  ;;  %v1197_v17 = vrot.slane %v1190_v11, %v5545_v23  ;;  %v1205_v18 = vrot.slane %v4595_v12, %v5545_v23 }
 0x4ff   : > { %v1384_v19 = vcombine.low %v1360_v13, %v1376_v14  ;;  %v1385_v31 = vcombine.high %v1360_v13, %v1376_v14  ;;  %v1386_v38 = vcombine.low %v1367_v32, %v1383_v33  ;;  %v1387_v40 = vcombine.high %v1367_v32, %v1383_v33 }
 0x500   : > { %v1206_v20 = vcombine.low %v1181_v15, %v1189_v16  ;;  %v1222_v21 = vcombine.low %v1197_v17, %v1205_v18  ;;  %v1207_v27 = vcombine.high %v1181_v15, %v1189_v16  ;;  %v1223_v28 = vcombine.high %v1197_v17, %v1205_v18 }
 0x501   : > { %4852 = vmatpush3.xpose.msk.msra.mxu1 %vm1534_vm3, %v1384_v19  ;;  %v1083_v1 = vadd.f32 %v4589_v0, %v5542_v8 }
 0x502   : > { %4856 = vmatprep.subr.mxu1 %v5254_v44  ;;  %v1214_v25 = vrot.slane %v1206_v20, %v5547_v30  ;;  %v1230_v26 = vrot.slane %v1222_v21, %v5547_v30  ;;  %v1221_v35 = vrot.slane %v1207_v27, %v5547_v30  ;;  %v1237_v37 = vrot.slane %v1223_v28, %v5547_v30 }
 0x503   : > { %v1095_v3 = vmul.f32 %v4593_v2, %v1083_v1 }
 0x504   : > { %v1238_v29 = vcombine.low %v1214_v25, %v1230_v26  ;;  %v1239_v34 = vcombine.high %v1214_v25, %v1230_v26  ;;  %v1240_v39 = vcombine.low %v1221_v35, %v1237_v37  ;;  %v1241_v41 = vcombine.high %v1221_v35, %v1237_v37 }
 0x506   : > { %4854 = vmatmul.mubr.msk.f32.vlgmr.msra.gmra.mrb[12].mxu1 %vm1534_vm3, %v1238_v29 }
 0x507   : > { %4857 = vmatpush3.xpose.msk.msra.mxu1 %vm1534_vm3, %v1385_v31  ;;  %4858 = vmatprep.mubr.msk.f32.mxu1 %vm5255_vm2, %v5254_v44 }
 0x508   : > { %4861 = vmatprep.subr.mxu1 %v5254_v44 }
 0x50a   : > { %4859 = vmatmul.mubr.msk.f32.vlgmr.msra.gmra.mrb[14].mxu1 %vm1534_vm3, %v1239_v34 }
 0x50b   : > { %4862 = vmatpush3.xpose.msk.msra.mxu1 %vm1534_vm3, %v1386_v38  ;;  %4863 = vmatprep.mubr.msk.f32.mxu1 %vm5255_vm2, %v5254_v44 }
 0x50c   : > { %4866 = vmatprep.subr.mxu1 %v5254_v44 }
 0x50e   : > { %4864 = vmatmul.mubr.msk.f32.vlgmr.msra.gmra.mrb[16].mxu1 %vm1534_vm3, %v1240_v39 }
 0x50f   : > { %4867 = vmatpush3.xpose.msk.msra.mxu1 %vm1534_vm3, %v1387_v40  ;;  %4868 = vmatprep.mubr.msk.f32.mxu1 %vm5255_vm2, %v5254_v44 }
 0x510   : > { %4871 = vmatprep.subr.mxu1 %v5254_v44 }
 0x512   : > { %4869 = vmatmul.mubr.msk.f32.vlgmr.msra.gmra.mrb[18].mxu1 %vm1534_vm3, %v1241_v41 }
 0x513   : > { %4873 = vmatprep.mubr.msk.f32.mxu1 %vm5255_vm2, %v5254_v44 }
 0x5d9   : > { %v1607_v42 = vpop.f32.mrb[12].mxu1 }
 0x5da   : > { %v1839_v45 = vmul.f32 0.35355338, %v1607_v42  ;;  %v4855_v46 = vpop.f32.mrb[13].mxu1 }
 0x5dc   : > { %v1849_v47 = vadd.f32 %v5604_v43, %v1839_v45 }
 0x5dd   : > { %v1683_v48 = vpop.f32.mrb[14].mxu1 }
 0x5de   : > { %v1840_v49 = vmul.f32 0.35355338, %v1683_v48  ;;  %v4860_v50 = vpop.f32.mrb[15].mxu1  ;;  %v1853_v51 = vsel %vm1534_vm3, %v1849_v47, -inf }
 0x5df   : > { %1854 = vmax.xlane.f32.xlu0 %v1853_v51 }
 0x5e0   : > { %v1850_v52 = vadd.f32 %v5604_v43, %v1840_v49 }
 0x5e1   : > { %v1759_v53 = vpop.f32.mrb[16].mxu1 }
 0x5e2   : > { %v1841_v54 = vmul.f32 0.35355338, %v1759_v53  ;;  %v4865_v55 = vpop.f32.mrb[17].mxu1  ;;  %v1856_v56 = vsel %vm1534_vm3, %v1850_v52, -inf }
 0x5e3   : > { %1857 = vmax.xlane.f32.xlu1 %v1856_v56 }
 0x5e4   : > { %v1851_v57 = vadd.f32 %v5604_v43, %v1841_v54 }
 0x5e5   : > { %v1835_v58 = vpop.f32.mrb[18].mxu1 }
 0x5e6   : > { %v1842_v59 = vmul.f32 0.35355338, %v1835_v58  ;;  %v4870_v60 = vpop.f32.mrb[19].mxu1  ;;  %v1859_v61 = vsel %vm1534_vm3, %v1851_v57, -inf }
 0x5e7   : > { %1860 = vmax.xlane.f32.xlu0 %v1859_v61 }
 0x5e8   : > { %v1852_v62 = vadd.f32 %v5604_v43, %v1842_v59 }
 0x5ea   : > { %v1862_v63 = vsel %vm1534_vm3, %v1852_v62, -inf }
 0x5eb   : > { %1863 = vmax.xlane.f32.xlu0 %v1862_v63 }
 0x5f4   : > { %1392 = vrot.lane.b32.xlu1 %v1095_v3, %s5257_s0 }
 0x5f8   : > { %1395 = vrot.lane.b32.xlu1 %v1095_v3, %s5258_s1 }
 0x66c   : > { %v1855_v4 = vpop.xlane.xlu0 %1854 }
 0x66d   : > { %v1865_v5 = vsub.f32 %v1849_v47, %v1855_v4 }
 0x66f   : > { %v1869_v6 = vmul.f32 1.442695, %v1865_v5 }
 0x670   : > { %v1858_v7 = vpop.xlane.xlu1 %1857 }
 0x671   : > { %5141 = vpow2.f32 %v1869_v6  ;;  %v1866_v9 = vsub.f32 %v1850_v52, %v1858_v7 }
 0x673   : > { %v1871_v10 = vmul.f32 1.442695, %v1866_v9 }
 0x674   : > { %v1861_v11 = vpop.xlane.xlu0 %1860  ;;  %v1393_v25 = vpop.permute.xlu1 %1392 }
 0x675   : > { %5143 = vpow2.f32 %v1871_v10  ;;  %v1867_v12 = vsub.f32 %v1851_v57, %v1861_v11  ;;  %v1398_v27 = vcombine.low %v1095_v3, %v1393_v25  ;;  %v1399_v28 = vcombine.high %v1095_v3, %v1393_v25 }
 0x677   : > { %v1873_v8 = vmul.f32 1.442695, %v1867_v12  ;;  %v1406_v34 = vrot.slane %v1398_v27, %v5545_v23  ;;  %v1413_v35 = vrot.slane %v1399_v28, %v5545_v23 }
 0x678   : > { %v1864_v19 = vpop.xlane.xlu0 %1863  ;;  %v1396_v29 = vpop.permute.xlu1 %1395 }
 0x679   : > { %5145 = vpow2.f32 %v1873_v8  ;;  %v1868_v20 = vsub.f32 %v1852_v62, %v1864_v19 }
 0x67b   : > { %v5142_v13 = vpop.eup %5141  ;;  %v1875_v21 = vmul.f32 1.442695, %v1868_v20 }
 0x67c   : > { %v1877_v14 = vsel %vm1534_vm3, %v5142_v13, 0.0 }
 0x67d   : > { %1878 = vadd.xlane.f32.xlu0 %v1877_v14  ;;  %5147 = vpow2.f32 %v1875_v21 }
 0x67f   : > { %v5624_v15 = vpop.eup %5143 }
 0x680   : > { %v1880_v16 = vsel %vm1534_vm3, %v5624_v15, 0.0 }
 0x681   : > { %1881 = vadd.xlane.f32.xlu1 %v1880_v16 }
 0x683   : > { %v5628_v17 = vpop.eup %5145 }
 0x684   : > { %v1883_v18 = vsel %vm1534_vm3, %v5628_v17, 0.0 }
 0x685   : > { %1884 = vadd.xlane.f32.xlu1 %v1883_v18 }
 0x687   : > { %v5633_v22 = vpop.eup %5147 }
 0x688   : > { %v1886_v24 = vsel %vm1534_vm3, %v5633_v22, 0.0 }
 0x693   : > { %1389 = vrot.lane.b32.xlu0 %v1095_v3, %s5256_s5 }
 0x6b2   : > { %1887 = vadd.xlane.f32.xlu0 %v1886_v24 }
 0x70a   : > { %v1879_v26 = vpop.xlane.xlu0 %1878 }
 0x70b   : > { %5149 = vrcp.f32 %v1879_v26 }
 0x70e   : > { %v1390_v31 = vpop.permute.xlu0 %1389  ;;  %v1882_v39 = vpop.xlane.xlu1 %1881 }
 0x70f   : > { %v1414_v32 = vcombine.low %v1390_v31, %v1396_v29  ;;  %v1415_v33 = vcombine.high %v1390_v31, %v1396_v29  ;;  %5151 = vrcp.f32 %v1882_v39  ;;  %v5105_v39 = vld [vmem:[%s6119_s10] sm:$0xff]  }
 0x711   : > { %v1422_v37 = vrot.slane %v1414_v32, %v5545_v23  ;;  %v1429_v38 = vrot.slane %v1415_v33, %v5545_v23 }
 0x712   : > { %v1885_v54 = vpop.xlane.xlu1 %1884 }
 0x713   : > { %v1430_v40 = vcombine.low %v1406_v34, %v1422_v37  ;;  %v1431_v41 = vcombine.high %v1406_v34, %v1422_v37  ;;  %v1446_v42 = vcombine.low %v1413_v35, %v1429_v38  ;;  %v1447_v45 = vcombine.high %v1413_v35, %v1429_v38 }
 0x714   : > { %5153 = vrcp.f32 %v1885_v54 }
 0x715   : > { %v1438_v46 = vrot.slane %v1430_v40, %v5547_v30  ;;  %v1445_v47 = vrot.slane %v1431_v41, %v5547_v30  ;;  %v1454_v48 = vrot.slane %v1446_v42, %v5547_v30  ;;  %v1461_v49 = vrot.slane %v1447_v45, %v5547_v30  ;;  %v5150_v61 = vpop.eup %5149 }
 0x716   : > { %v1893_v4 = vmul.f32 %v5150_v61, %v5142_v13 }
 0x717   : > { %v1466_v50 = vcombine.low %v1438_v46, %v1445_v47  ;;  %v4598_v51 = vcombine.high %v1438_v46, %v1445_v47  ;;  %v1482_v52 = vcombine.low %v1454_v48, %v1461_v49  ;;  %v4599_v53 = vcombine.high %v1454_v48, %v1461_v49 }
 0x719   : > { %v1473_v55 = vrot.slane %v1466_v50, %v5545_v23  ;;  %v1481_v56 = vrot.slane %v4598_v51, %v5545_v23  ;;  %v1489_v57 = vrot.slane %v1482_v52, %v5545_v23  ;;  %v1497_v58 = vrot.slane %v4599_v53, %v5545_v23  ;;  %v5152_v3 = vpop.eup %5151  ;;  %v5106_v50 = vld [vmem:[%s6119_s10 + $0x8] sm:$0xff]  }
 0x71a   : > { %v1894_v9 = vmul.f32 %v5152_v3, %v5624_v15 }
 0x71b   : > { %v1498_v59 = vcombine.low %v1473_v55, %v1481_v56  ;;  %v1514_v60 = vcombine.low %v1489_v57, %v1497_v58  ;;  %v1499_v0 = vcombine.high %v1473_v55, %v1481_v56  ;;  %v1515_v1 = vcombine.high %v1489_v57, %v1497_v58 }
 0x71d   : > { %v1506_v62 = vrot.slane %v1498_v59, %v5547_v30  ;;  %v1522_v63 = vrot.slane %v1514_v60, %v5547_v30  ;;  %v1513_v6 = vrot.slane %v1499_v0, %v5547_v30  ;;  %v1529_v7 = vrot.slane %v1515_v1, %v5547_v30 }
 0x71e   : > { %v5154_v10 = vpop.eup %5153 }
 0x71f   : > { %v1530_v2 = vcombine.low %v1506_v62, %v1522_v63  ;;  %v1531_v5 = vcombine.high %v1506_v62, %v1522_v63  ;;  %v1532_v11 = vcombine.low %v1513_v6, %v1529_v7  ;;  %v1895_v12 = vmul.f32 %v5154_v10, %v5628_v17 }
 0x720   : > { %v1533_v8 = vcombine.high %v1513_v6, %v1529_v7 }
 0x721   : > { %4872 = vmatpush3.msra.mxu1 %v1530_v2 }
 0x722   : > { %4874 = vmatmul.mubr.msk.f32.vlgmr.msra.gmra.mrb[20].mxu1 %vm1534_vm3, %v1893_v4  ;;  %4876 = vmatprep.subr.mxu1 %v5254_v44 }
 0x723   : > { %4877 = vmatpush3.msra.mxu1 %v1531_v5  ;;  %4878 = vmatprep.mubr.msk.f32.mxu1 %vm5255_vm2, %v5254_v44 }
 0x724   : > { %4881 = vmatprep.subr.mxu1 %v5254_v44 }
 0x726   : > { %4879 = vmatmul.mubr.msk.f32.vlgmr.msra.gmra.mrb[22].mxu1 %vm1534_vm3, %v1894_v9 }
 0x727   : > { %4882 = vmatpush3.msra.mxu1 %v1532_v11  ;;  %4883 = vmatprep.mubr.msk.f32.mxu1 %vm5255_vm2, %v5254_v44 }
 0x728   : > { %4886 = vmatprep.subr.mxu1 %v5254_v44 }
 0x72a   : > { %4884 = vmatmul.mubr.msk.f32.vlgmr.msra.gmra.mrb[24].mxu1 %vm1534_vm3, %v1895_v12  ;;  %v4618_v12 = vld [vmem:[%s6120_s11] ss:$0 sm:$0xff] }
 0x72b   : > { %4887 = vmatpush3.msra.mxu1 %v1533_v8  ;;  %4888 = vmatprep.mubr.msk.f32.mxu1 %vm5255_vm2, %v5254_v44 }
 0x72c   : > { %4891 = vmatprep.subr.bf16.mxu1 %v5254_v44 }
 0x73f   : > { %v1888_v13 = vpop.xlane.xlu0 %1887 }
 0x740   : > { %5155 = vrcp.f32 %v1888_v13 }
 0x74a   : > { %v5156_v14 = vpop.eup %5155 }
 0x74b   : > { %v1896_v15 = vmul.f32 %v5156_v14, %v5633_v22 }
 0x74d   : > { %4889 = vmatmul.mubr.msk.f32.vlgmr.msra.gmra.mrb[26].mxu1 %vm1534_vm3, %v1896_v15 }
 0x74e   : > { %4895 = vmatprep.mubr.msk.bf16.mxu1 %vm5255_vm2, %v5254_v44  ;;  %4892 = vmatpush3.bf16.msra.mxu1 %v5105_v39  ;;  %v5111_v39 = vld [vmem:[%s6125_s16 + $0x10] sm:$0xff]  }
 0x74f   : > { %4893 = vmatprep.subr.bf16.mxu1 %v5254_v44 }
 0x752   : > { %4894 = vmatpush3.bf16.msra.mxu1 %v5106_v50 }
 0x753   : > { %4899 = vmatprep.subr.bf16.mxu1 %v5254_v44 }
 0x7f5   : > { %v1966_v16 = vpop.f32.mrb[20].mxu1 }
 0x7f6   : > { %v4875_v17 = vpop.f32.mrb[21].mxu1 }
 0x7f9   : > { %v2039_v18 = vpop.f32.mrb[22].mxu1 }
 0x7fa   : > { %v4880_v19 = vpop.f32.mrb[23].mxu1 }
 0x7fd   : > { %v2112_v20 = vpop.f32.mrb[24].mxu1 }
 0x7fe   : > { %v2189_v21 = vcombine.low %v1966_v16, %v2112_v20  ;;  %v2190_v24 = vcombine.high %v1966_v16, %v2112_v20  ;;  %v4885_v25 = vpop.f32.mrb[25].mxu1 }
 0x7ff   : > { %v5108_v25 = vld [vmem:[%s6123_s14 + $0x8] sm:$0xff]  }
 0x800   : > { %v2197_v31 = vrot.slane %v2189_v21, %v5545_v23  ;;  %v2204_v22 = vrot.slane %v2190_v24, %v5545_v23 }
 0x820   : > { %v2185_v26 = vpop.f32.mrb[26].mxu1 }
 0x821   : > { %v2205_v27 = vcombine.low %v2039_v18, %v2185_v26  ;;  %v2206_v28 = vcombine.high %v2039_v18, %v2185_v26  ;;  %v4890_v29 = vpop.f32.mrb[27].mxu1 }
 0x823   : > { %v2213_v32 = vrot.slane %v2205_v27, %v5545_v23  ;;  %v2220_v33 = vrot.slane %v2206_v28, %v5545_v23 }
 0x825   : > { %v2221_v34 = vcombine.low %v2197_v31, %v2213_v32  ;;  %v2222_v35 = vcombine.high %v2197_v31, %v2213_v32  ;;  %v2237_v37 = vcombine.low %v2204_v22, %v2220_v33  ;;  %v2238_v38 = vcombine.high %v2204_v22, %v2220_v33  ;;  %v4619_v31 = vld [vmem:[%s6121_s12] ss:$0 sm:$0xff] }
 0x826   : > { %v4620_v32 = vld [vmem:[%s6122_s13] ss:$0 sm:$0xff] }
 0x827   : > { %v2229_v40 = vrot.slane %v2221_v34, %v5547_v30  ;;  %v2236_v41 = vrot.slane %v2222_v35, %v5547_v30  ;;  %v2245_v42 = vrot.slane %v2237_v37, %v5547_v30  ;;  %v2252_v45 = vrot.slane %v2238_v38, %v5547_v30  ;;  %v5109_v37 = vld [vmem:[%s6125_s16] sm:$0xff]   ;;  %v5110_v38 = vld [vmem:[%s6125_s16 + $0x8] sm:$0xff]  }
 0x828   : > { %4908 = vmatpush3.bf16.msra.mxu0 %v5109_v37 }
 0x829   : > { %v2257_v46 = vcombine.low %v2229_v40, %v2236_v41  ;;  %v4613_v47 = vcombine.high %v2229_v40, %v2236_v41  ;;  %v2273_v48 = vcombine.low %v2245_v42, %v2252_v45  ;;  %v4614_v49 = vcombine.high %v2245_v42, %v2252_v45  ;;  %4909 = vmatprep.subr.bf16.mxu0 %v5254_v44  ;;  %v5112_v40 = vld [vmem:[%s6125_s16 + $0x18] sm:$0xff]   ;;  %v5113_v41 = vld [vmem:[%s6125_s16 + $0x20] sm:$0xff]   ;;  %v5114_v42 = vld [vmem:[%s6125_s16 + $0x28] sm:$0xff]  }
 0x82a   : > { %v5115_v45 = vld [vmem:[%s6125_s16 + $0x30] sm:$0xff]  }
 0x82b   : > { %v2264_v51 = vrot.slane %v2257_v46, %v5545_v23  ;;  %v2272_v52 = vrot.slane %v4613_v47, %v5545_v23  ;;  %v2280_v53 = vrot.slane %v2273_v48, %v5545_v23  ;;  %v2288_v54 = vrot.slane %v4614_v49, %v5545_v23  ;;  %v5116_v46 = vld [vmem:[%s6125_s16 + $0x38] sm:$0xff]   ;;  %v4621_v47 = vld [vmem:[%s6124_s15] ss:$0 sm:$0xff] }
 0x82c   : > { %4910 = vmatpush3.bf16.msra.mxu0 %v5110_v38 }
 0x82d   : > { %v2290_v55 = vcombine.high %v2264_v51, %v2272_v52  ;;  %v2306_v56 = vcombine.high %v2280_v53, %v2288_v54  ;;  %v2289_v57 = vcombine.low %v2264_v51, %v2272_v52  ;;  %v2305_v58 = vcombine.low %v2280_v53, %v2288_v54  ;;  %4911 = vmatprep.subr.bf16.mxu0 %v5254_v44 }
 0x82f   : > { %v2304_v59 = vrot.slane %v2290_v55, %v5547_v30  ;;  %v2320_v60 = vrot.slane %v2306_v56, %v5547_v30  ;;  %v2297_v61 = vrot.slane %v2289_v57, %v5547_v30  ;;  %v2313_v62 = vrot.slane %v2305_v58, %v5547_v30 }
 0x830   : > { %4912 = vmatpush3.bf16.msra.mxu0 %v5111_v39 }
 0x831   : > { %v2323_v63 = vcombine.low %v2304_v59, %v2320_v60  ;;  %v2322_v0 = vcombine.high %v2297_v61, %v2313_v62  ;;  %v2324_v1 = vcombine.high %v2304_v59, %v2320_v60  ;;  %v2321_v2 = vcombine.low %v2297_v61, %v2313_v62  ;;  %4913 = vmatprep.subr.bf16.mxu0 %v5254_v44  ;;  %v4626_v60 = vld [vmem:[%s6126_s17] ss:$0 sm:$0xff] }
 0x833   : > { %2330 = vrot.lane.b32.xlu1 %v2323_v63, %s6143_s22  ;;  %2326 = vrot.lane.b32.xlu0 %v2322_v0, %s6142_s30 }
 0x834   : > { %4914 = vmatpush3.bf16.msra.mxu0 %v5112_v40 }
 0x835   : > { %4915 = vmatprep.subr.bf16.mxu0 %v5254_v44 }
 0x837   : > { %2334 = vrot.lane.b32.xlu1 %v2324_v1, %s6141_s3  ;;  %s6169_s3 = smov 24  }
 0x838   : > { %4916 = vmatpush3.bf16.msra.mxu0 %v5113_v41 }
 0x839   : > { %4917 = vmatprep.subr.bf16.mxu0 %v5254_v44 }
 0x83c   : > { %4918 = vmatpush3.bf16.msra.mxu0 %v5114_v42 }
 0x83d   : > { %4919 = vmatprep.subr.bf16.mxu0 %v5254_v44 }
 0x840   : > { %4920 = vmatpush3.bf16.msra.mxu0 %v5115_v45 }
 0x841   : > { %4921 = vmatprep.subr.bf16.mxu0 %v5254_v44 }
 0x844   : > { %4922 = vmatpush3.bf16.msra.mxu0 %v5116_v46 }
 0x845   : > { %4961 = vmatprep.subr.mxu0 %v5254_v44 }
 0x8a5   : > { %v2331_v3 = vpop.permute.xlu1 %2330  ;;  %v2327_v4 = vpop.permute.xlu0 %2326 }
 0x8a6   : > { %v2337_v5 = vsel %vm1534_vm3, %v2321_v2, %v2327_v4 }
 0x8a7   : > { %v2339_v7 = vsel %vm2338_vm4, %v2337_v5, %v2331_v3 }
 0x8a9   : > { %v2335_v6 = vpop.permute.xlu1 %2334 }
 0x8aa   : > { %v2341_v9 = vsel %vm2340_vm5, %v2339_v7, %v2335_v6 }
 0x8ab   : > { %v2342_v10 = vpack.c.bf16 %v2341_v9, %v2341_v9 }
 0x8ad   : > { %4896 = vmatmul.mubr.msk.bf16.vlgmr.msra.gmra.mrb[28].mxu1 %vm832_vm1, %v2342_v10  ;;  %v5117_v10 = vld [vmem:[%s6117_s8 + $0x30] sm:$0xff]  }
 0x8ae   : > { %4903 = vmatprep.mubr.msk.bf16.mxu1 %vm5255_vm2, %v5254_v44 }
 0x980   : > { %v2396_v11 = vpop.f32.mrb[28].mxu1 }
 0x981   : > { %v2402_v8 = vadd.f32 %v2396_v11, %v5480_v36  ;;  %v4897_v13 = vpop.f32.mrb[29].mxu1  ;;  %v5107_v36 = vld [vmem:[%s6123_s14] sm:$0xff]   ;;  %v5118_v11 = vld [vmem:[%s6117_s8 + $0x38] sm:$0xff]  }
 0x982   : > { %v2399_v14 = vpop.f32.mrb[30].mxu1  ;;  %4900 = vmatpush3.bf16.msra.mxu1 %v5107_v36  ;;  %v5121_v36 = vld [vmem:[%s6117_s8 + $0x50] sm:$0xff]  }
 0x983   : > { %v5709_v15 = vadd.f32 %v4618_v12, %v2402_v8  ;;  %v4898_v16 = vpop.f32.mrb[31].mxu1  ;;  %4901 = vmatprep.subr.bf16.mxu1 %v5254_v44 }
 0x985   : > { %v2413_v17 = vsel %vm832_vm1, %v5709_v15, 0.0 }
 0x986   : > { %2414 = vadd.xlane.f32.xlu0 %v2413_v17  ;;  %4902 = vmatpush3.bf16.msra.mxu1 %v5108_v25  ;;  %v4638_v17 = vld [vmem:[%s6116_s7 + $0x1] ss:$0 sm:$0xff]  ;;  %v5122_v25 = vld [vmem:[%s6117_s8 + $0x58] sm:$0xff]  }
 0x987   : > { %4927 = vmatprep.subr.bf16.mxu1 %v5254_v44 }
 0xa13   : > { %v2415_v18 = vpop.xlane.xlu0 %2414 }
 0xa14   : > { %v2416_v19 = vmul.f32 0.03125, %v2415_v18 }
 0xa16   : > { %v2417_v20 = vsub.f32 %v5709_v15, %v2416_v19 }
 0xa18   : > { %v2418_v21 = vmul.f32 %v2417_v20, %v2417_v20 }
 0xa1a   : > { %v2419_v24 = vsel %vm832_vm1, %v2418_v21, 0.0 }
 0xa1b   : > { %2420 = vadd.xlane.f32.xlu1 %v2419_v24  ;;  %v5120_v24 = vld [vmem:[%s6117_s8 + $0x48] sm:$0xff]  }
 0xaa8   : > { %v2421_v26 = vpop.xlane.xlu1 %2420 }
 0xaa9   : > { %v2422_v27 = vmul.f32 0.03125, %v2421_v26  ;;  %v4644_v26 = vld [vmem:[%s6118_s9 + $0x3] ss:$0 sm:$0xff] }
 0xaab   : > { %v2423_v28 = vadd.f32 1e-05, %v2422_v27 }
 0xaad   : > { %5157 = vrsqrt.f32 %v2423_v28 }
 0xab7   : > { %v5158_v29 = vpop.eup %5157 }
 0xab8   : > { %v2425_v22 = vmul.f32 %v5158_v29, %v2417_v20  ;;  %v5119_v20 = vld [vmem:[%s6117_s8 + $0x40] sm:$0xff]  }
 0xaba   : > { %v2432_v33 = vmul.f32 %v4619_v31, %v2425_v22 }
 0xabc   : > { %v2439_v34 = vadd.f32 %v4620_v32, %v2432_v33  ;;  %v4653_v32 = vld [vmem:[%s6118_s9 + $0x4] ss:$0 sm:$0xff] }
 0xabe   : > { %v2440_v35 = vpack.c.bf16 %v2439_v34, %v2439_v34 }
 0xac0   : > { %4904 = vmatmul.mubr.msk.bf16.vlgmr.msra.gmra.mrb[32].mxu1 %vm832_vm1, %v2440_v35 }
 0xac1   : > { %4931 = vmatprep.mubr.msk.bf16.mxu1 %vm5255_vm2, %v5254_v44  ;;  %4928 = vmatpush3.bf16.msra.mxu1 %v5117_v10 }
 0xac2   : > { %4929 = vmatprep.subr.bf16.mxu1 %v5254_v44 }
 0xac5   : > { %4930 = vmatpush3.bf16.msra.mxu1 %v5118_v11 }
 0xac6   : > { %4935 = vmatprep.subr.bf16.mxu1 %v5254_v44 }
 0xb93   : > { %v2501_v48 = vpop.f32.mrb[32].mxu1 }
 0xb94   : > { %v2502_v49 = vadd.f32 %v4621_v47, %v2501_v48  ;;  %v4905_v50 = vpop.f32.mrb[33].mxu1 }
 0xb95   : > { %v2504_v51 = vpop.f32.mrb[34].mxu1 }
 0xb96   : > { %v4625_v52 = vmul.f32 -1.702, %v2502_v49  ;;  %v4906_v53 = vpop.f32.mrb[35].mxu1 }
 0xb98   : > { %v2509_v54 = vmul.f32 1.442695, %v4625_v52 }
 0xb9a   : > { %5159 = vpow2.f32 %v2509_v54 }
 0xba4   : > { %v5160_v55 = vpop.eup %5159 }
 0xba5   : > { %v2511_v56 = vadd.f32 1.0, %v5160_v55 }
 0xba7   : > { %5161 = vrcp.f32 %v2511_v56 }
 0xbb1   : > { %v5162_v57 = vpop.eup %5161 }
 0xbb2   : > { %v2514_v58 = vmul.f32 %v5162_v57, %v2502_v49 }
 0xbb4   : > { %v2515_v59 = vpack.c.bf16 %v2514_v58, %v2514_v58 }
 0xbb6   : > { %4924 = vmatmul.mubr.bf16.vlgmr.msra.gmra.mrb[4].mxu0 %v2515_v59 }
 0xbb7   : > { %4963 = vmatprep.mubr.msk.f32.mxu0 %vm5255_vm2, %v5254_v44 }
 0xc89   : > { %v2621_v61 = vpop.f32.mrb[4].mxu0 }
 0xc8a   : > { %v2622_v62 = vadd.f32 %v4626_v60, %v2621_v61  ;;  %v4925_v63 = vpop.f32.mrb[5].mxu0 }
 0xc8b   : > { %v2624_v0 = vpop.f32.mrb[6].mxu0 }
 0xc8c   : > { %v5773_v1 = vadd.f32 %v2622_v62, %v5709_v15  ;;  %v4926_v2 = vpop.f32.mrb[7].mxu0  ;;  %v4637_v15 = vld [vmem:[%s6165_s25 + $0x1] ss:$0 sm:$0xff] }
 0xc8e   : > { %v2632_v3 = vsel %vm832_vm1, %v5773_v1, 0.0 }
 0xc8f   : > { %2633 = vadd.xlane.f32.xlu0 %v2632_v3 }
 0xd1c   : > { %v2634_v4 = vpop.xlane.xlu0 %2633 }
 0xd1d   : > { %v2635_v5 = vmul.f32 0.03125, %v2634_v4 }
 0xd1f   : > { %v2636_v6 = vsub.f32 %v5773_v1, %v2635_v5 }
 0xd21   : > { %v2637_v7 = vmul.f32 %v2636_v6, %v2636_v6 }
 0xd23   : > { %v2638_v9 = vsel %vm832_vm1, %v2637_v7, 0.0 }
 0xd24   : > { %2639 = vadd.xlane.f32.xlu0 %v2638_v9 }
 0xdb1   : > { %v2640_v12 = vpop.xlane.xlu0 %2639 }
 0xdb2   : > { %v2641_v8 = vmul.f32 0.03125, %v2640_v12 }
 0xdb4   : > { %v2642_v13 = vadd.f32 1e-05, %v2641_v8 }
 0xdb6   : > { %5163 = vrsqrt.f32 %v2642_v13 }
 0xdc0   : > { %v5164_v14 = vpop.eup %5163 }
 0xdc1   : > { %v2644_v16 = vmul.f32 %v5164_v14, %v2636_v6 }
 0xdc3   : > { %v2651_v18 = vmul.f32 %v4637_v15, %v2644_v16 }
 0xdc5   : > { %v2658_v19 = vadd.f32 %v4638_v17, %v2651_v18 }
 0xdc7   : > { %v2659_v21 = vpack.c.bf16 %v2658_v19, %v2658_v19 }
 0xdc9   : > { %4932 = vmatmul.mubr.msk.bf16.vlgmr.msra.gmra.mrb[36].mxu1 %vm832_vm1, %v2659_v21 }
 0xdca   : > { %4936 = vmatpush3.bf16.msra.mxu1 %v5119_v20  ;;  %4939 = vmatprep.mubr.msk.bf16.mxu1 %vm5255_vm2, %v5254_v44 }
 0xdcb   : > { %4937 = vmatprep.subr.bf16.mxu1 %v5254_v44 }
 0xdce   : > { %4938 = vmatpush3.bf16.msra.mxu1 %v5120_v24 }
 0xdcf   : > { %4943 = vmatprep.subr.bf16.mxu1 %v5254_v44 }
 0xdd1   : > { %4940 = vmatmul.mubr.msk.bf16.vlgmr.msra.gmra.mrb[40].mxu1 %vm832_vm1, %v2659_v21 }
 0xdd2   : > { %4944 = vmatpush3.bf16.msra.mxu1 %v5121_v36  ;;  %4947 = vmatprep.mubr.msk.bf16.mxu1 %vm5255_vm2, %v5254_v44 }
 0xdd3   : > { %4945 = vmatprep.subr.bf16.mxu1 %v5254_v44 }
 0xdd6   : > { %4946 = vmatpush3.bf16.msra.mxu1 %v5122_v25 }
 0xdd7   : > { %4951 = vmatprep.subr.mxu1 %v5254_v44 }
 0xdd9   : > { %4948 = vmatmul.mubr.msk.bf16.vlgmr.msra.gmra.mrb[44].mxu1 %vm832_vm1, %v2659_v21 }
 0xdda   : > { %4953 = vmatprep.mubr.msk.f32.mxu1 %vm5255_vm2, %v5254_v44 }
 0xe9c   : > { %v2722_v27 = vpop.f32.mrb[36].mxu1 }
 0xe9d   : > { %v2723_v28 = vadd.f32 %v4644_v26, %v2722_v27  ;;  %v4933_v29 = vpop.f32.mrb[37].mxu1 }
 0xe9e   : > { %v2725_v31 = vpop.f32.mrb[38].mxu1 }
 0xe9f   : > { %2868 = vrot.lane.b32.xlu1 %v2723_v28, %s5256_s5  ;;  %v4934_v22 = vpop.f32.mrb[39].mxu1 }
 0xea4   : > { %v2787_v33 = vpop.f32.mrb[40].mxu1 }
 0xea5   : > { %v2788_v34 = vadd.f32 %v4653_v32, %v2787_v33  ;;  %v4941_v35 = vpop.f32.mrb[41].mxu1 }
 0xea6   : > { %v2790_v37 = vpop.f32.mrb[42].mxu1 }
 0xea7   : > { %3017 = vrot.lane.b32.xlu1 %v2788_v34, %s5257_s0  ;;  %3014 = vrot.lane.b32.xlu0 %v2788_v34, %s5256_s5  ;;  %v4942_v38 = vpop.f32.mrb[43].mxu1 }
 0xeab   : > { %3020 = vrot.lane.b32.xlu1 %v2788_v34, %s5258_s1  ;;  %2871 = vrot.lane.b32.xlu0 %v2723_v28, %s5257_s0 }
 0xeac   : > { %v5829_v39 = vpop.f32.mrb[44].mxu1 }
 0xead   : > { %v4949_v40 = vpop.f32.mrb[45].mxu1 }
 0xeae   : > { %v2855_v41 = vpop.f32.mrb[46].mxu1 }
 0xeaf   : > { %2874 = vrot.lane.b32.xlu1 %v2723_v28, %s5258_s1  ;;  %v4950_v42 = vpop.f32.mrb[47].mxu1 }
 0xf11   : > { %v2869_v45 = vpop.permute.xlu1 %2868 }
 0xf19   : > { %v3018_v46 = vpop.permute.xlu1 %3017  ;;  %v3015_v47 = vpop.permute.xlu0 %3014 }
 0xf1a   : > { %v3023_v48 = vcombine.low %v2788_v34, %v3018_v46  ;;  %v3024_v49 = vcombine.high %v2788_v34, %v3018_v46 }
 0xf1c   : > { %v3031_v54 = vrot.slane %v3023_v48, %v5545_v23  ;;  %v3038_v55 = vrot.slane %v3024_v49, %v5545_v23 }
 0xf1d   : > { %v3021_v50 = vpop.permute.xlu1 %3020  ;;  %v2872_v53 = vpop.permute.xlu0 %2871 }
 0xf1e   : > { %v3039_v51 = vcombine.low %v3015_v47, %v3021_v50  ;;  %v3040_v52 = vcombine.high %v3015_v47, %v3021_v50  ;;  %v2877_v58 = vcombine.low %v2723_v28, %v2872_v53  ;;  %v2878_v59 = vcombine.high %v2723_v28, %v2872_v53 }
 0xf20   : > { %v3047_v56 = vrot.slane %v3039_v51, %v5545_v23  ;;  %v3054_v57 = vrot.slane %v3040_v52, %v5545_v23  ;;  %v2885_v9 = vrot.slane %v2877_v58, %v5545_v23  ;;  %v2892_v10 = vrot.slane %v2878_v59, %v5545_v23 }
 0xf21   : > { %v2875_v60 = vpop.permute.xlu1 %2874 }
 0xf22   : > { %v3055_v61 = vcombine.low %v3031_v54, %v3047_v56  ;;  %v3056_v62 = vcombine.high %v3031_v54, %v3047_v56  ;;  %v3071_v63 = vcombine.low %v3038_v55, %v3054_v57  ;;  %v3072_v0 = vcombine.high %v3038_v55, %v3054_v57 }
 0xf23   : > { %v2893_v2 = vcombine.low %v2869_v45, %v2875_v60  ;;  %v2894_v3 = vcombine.high %v2869_v45, %v2875_v60 }
 0xf24   : > { %v3063_v4 = vrot.slane %v3055_v61, %v5547_v30  ;;  %v3070_v5 = vrot.slane %v3056_v62, %v5547_v30  ;;  %v3079_v6 = vrot.slane %v3071_v63, %v5547_v30  ;;  %v3086_v7 = vrot.slane %v3072_v0, %v5547_v30 }
 0xf25   : > { %v2901_v11 = vrot.slane %v2893_v2, %v5545_v23  ;;  %v2908_v12 = vrot.slane %v2894_v3, %v5545_v23 }
 0xf26   : > { %v3091_v8 = vcombine.low %v3063_v4, %v3070_v5  ;;  %v4670_v13 = vcombine.high %v3063_v4, %v3070_v5  ;;  %v3107_v14 = vcombine.low %v3079_v6, %v3086_v7  ;;  %v4671_v15 = vcombine.high %v3079_v6, %v3086_v7 }
 0xf27   : > { %v2909_v16 = vcombine.low %v2885_v9, %v2901_v11  ;;  %v2910_v17 = vcombine.high %v2885_v9, %v2901_v11  ;;  %v2925_v18 = vcombine.low %v2892_v10, %v2908_v12  ;;  %v2926_v19 = vcombine.high %v2892_v10, %v2908_v12 }
 0xf28   : > { %v3098_v20 = vrot.slane %v3091_v8, %v5545_v23  ;;  %v3106_v21 = vrot.slane %v4670_v13, %v5545_v23  ;;  %v3114_v24 = vrot.slane %v3107_v14, %v5545_v23  ;;  %v3122_v36 = vrot.slane %v4671_v15, %v5545_v23 }
 0xf29   : > { %v2917_v25 = vrot.slane %v2909_v16, %v5547_v30  ;;  %v2924_v26 = vrot.slane %v2910_v17, %v5547_v30  ;;  %v2933_v27 = vrot.slane %v2925_v18, %v5547_v30  ;;  %v2940_v28 = vrot.slane %v2926_v19, %v5547_v30 }
 0xf2a   : > { %v3123_v29 = vcombine.low %v3098_v20, %v3106_v21  ;;  %v3124_v31 = vcombine.high %v3098_v20, %v3106_v21  ;;  %v3139_v22 = vcombine.low %v3114_v24, %v3122_v36  ;;  %v3140_v32 = vcombine.high %v3114_v24, %v3122_v36  ;;  %v4662_v24 = vld [vmem:[%s6118_s9 + $0x5] ss:$0 sm:$0xff] }
 0xf2b   : > { %v2945_v33 = vcombine.low %v2917_v25, %v2924_v26  ;;  %v4668_v34 = vcombine.high %v2917_v25, %v2924_v26  ;;  %v2961_v35 = vcombine.low %v2933_v27, %v2940_v28  ;;  %v4669_v37 = vcombine.high %v2933_v27, %v2940_v28  ;;  %v4667_v25 = vld [vmem:[%s6127_s18 + $0x1] ss:$0 sm:$0xff] }
 0xf2c   : > { %v3131_v38 = vrot.slane %v3123_v29, %v5547_v30  ;;  %v3147_v40 = vrot.slane %v3139_v22, %v5547_v30  ;;  %v3138_v41 = vrot.slane %v3124_v31, %v5547_v30  ;;  %v3154_v42 = vrot.slane %v3140_v32, %v5547_v30 }
 0xf2d   : > { %v2952_v45 = vrot.slane %v2945_v33, %v5545_v23  ;;  %v2960_v46 = vrot.slane %v4668_v34, %v5545_v23  ;;  %v2968_v47 = vrot.slane %v2961_v35, %v5545_v23  ;;  %v2976_v48 = vrot.slane %v4669_v37, %v5545_v23 }
 0xf2e   : > { %v3155_v49 = vcombine.low %v3131_v38, %v3147_v40  ;;  %v3157_v50 = vcombine.low %v3138_v41, %v3154_v42  ;;  %v3156_v61 = vcombine.high %v3131_v38, %v3147_v40  ;;  %v3158_v63 = vcombine.high %v3138_v41, %v3154_v42 }
 0xf2f   : > { %v2977_v51 = vcombine.low %v2952_v45, %v2960_v46  ;;  %v2978_v52 = vcombine.high %v2952_v45, %v2960_v46  ;;  %v2993_v53 = vcombine.low %v2968_v47, %v2976_v48  ;;  %v2994_v54 = vcombine.high %v2968_v47, %v2976_v48 }
 0xf30   : > { %4952 = vmatpush3.xpose.msk.msra.mxu1 %vm1534_vm3, %v3155_v49  ;;  %4962 = vmatpush3.xpose.msk.msra.mxu0 %vm1534_vm3, %v3157_v50  ;;  %v2853_v36 = vadd.f32 %v4662_v24, %v5829_v39 }
 0xf31   : > { %4956 = vmatprep.subr.mxu1 %v5254_v44  ;;  %v2985_v55 = vrot.slane %v2977_v51, %v5547_v30  ;;  %v3001_v56 = vrot.slane %v2993_v53, %v5547_v30  ;;  %v2992_v57 = vrot.slane %v2978_v52, %v5547_v30  ;;  %v3008_v58 = vrot.slane %v2994_v54, %v5547_v30 }
 0xf32   : > { %4971 = vmatprep.subr.mxu0 %v5254_v44  ;;  %v2866_v26 = vmul.f32 %v4667_v25, %v2853_v36 }
 0xf33   : > { %v3009_v59 = vcombine.low %v2985_v55, %v3001_v56  ;;  %v3011_v60 = vcombine.low %v2992_v57, %v3008_v58  ;;  %v3010_v62 = vcombine.high %v2985_v55, %v3001_v56  ;;  %v3012_v0 = vcombine.high %v2992_v57, %v3008_v58 }
 0xf35   : > { %4954 = vmatmul.mubr.msk.f32.vlgmr.msra.gmra.mrb[48].mxu1 %vm1534_vm3, %v3009_v59  ;;  %4964 = vmatmul.mubr.msk.f32.vlgmr.msra.gmra.mrb[8].mxu0 %vm1534_vm3, %v3011_v60 }
 0xf36   : > { %4957 = vmatpush3.xpose.msk.msra.mxu1 %vm1534_vm3, %v3156_v61  ;;  %4958 = vmatprep.mubr.msk.f32.mxu1 %vm5255_vm2, %v5254_v44 }
 0xf37   : > { %4966 = vmatprep.subr.mxu1 %v5254_v44  ;;  %4973 = vmatprep.mubr.msk.f32.mxu0 %vm5255_vm2, %v5254_v44 }
 0xf39   : > { %4959 = vmatmul.mubr.msk.f32.vlgmr.msra.gmra.mrb[50].mxu1 %vm1534_vm3, %v3010_v62 }
 0xf3a   : > { %4967 = vmatpush3.xpose.msk.msra.mxu1 %vm1534_vm3, %v3158_v63  ;;  %4968 = vmatprep.mubr.msk.f32.mxu1 %vm5255_vm2, %v5254_v44 }
 0xf3b   : > { %4976 = vmatprep.subr.mxu1 %v5254_v44 }
 0xf3d   : > { %4969 = vmatmul.mubr.msk.f32.vlgmr.msra.gmra.mrb[52].mxu1 %vm1534_vm3, %v3012_v0 }
 0xf3e   : > { %4978 = vmatprep.mubr.msk.f32.mxu1 %vm5255_vm2, %v5254_v44 }
0x1008   : > { %v3377_v2 = vpop.f32.mrb[48].mxu1  ;;  %v3529_v3 = vpop.f32.mrb[8].mxu0 }
0x1009   : > { %v3609_v4 = vmul.f32 0.35355338, %v3377_v2  ;;  %v3611_v5 = vmul.f32 0.35355338, %v3529_v3  ;;  %v4955_v6 = vpop.f32.mrb[49].mxu1  ;;  %v4965_v7 = vpop.f32.mrb[9].mxu0 }
0x100b   : > { %v3613_v9 = vadd.f32 %v5604_v43, %v3609_v4  ;;  %v3615_v13 = vadd.f32 %v5604_v43, %v3611_v5 }
0x100c   : > { %v3453_v10 = vpop.f32.mrb[50].mxu1 }
0x100d   : > { %v3610_v11 = vmul.f32 0.35355338, %v3453_v10  ;;  %v4960_v12 = vpop.f32.mrb[51].mxu1  ;;  %v3617_v8 = vsel %vm1534_vm3, %v3613_v9, -inf  ;;  %v3623_v18 = vsel %vm1534_vm3, %v3615_v13, -inf }
0x100e   : > { %3618 = vmax.xlane.f32.xlu0 %v3617_v8 }
0x100f   : > { %v3614_v14 = vadd.f32 %v5604_v43, %v3610_v11 }
0x1010   : > { %v3605_v15 = vpop.f32.mrb[52].mxu1 }
0x1011   : > { %v3612_v16 = vmul.f32 0.35355338, %v3605_v15  ;;  %v4970_v17 = vpop.f32.mrb[53].mxu1  ;;  %v3620_v19 = vsel %vm1534_vm3, %v3614_v14, -inf }
0x1012   : > { %3624 = vmax.xlane.f32.xlu0 %v3623_v18  ;;  %3621 = vmax.xlane.f32.xlu1 %v3620_v19 }
0x1013   : > { %v3616_v20 = vadd.f32 %v5604_v43, %v3612_v16 }
0x1015   : > { %v3626_v21 = vsel %vm1534_vm3, %v3616_v20, -inf }
0x1016   : > { %3627 = vmax.xlane.f32.xlu0 %v3626_v21 }
0x1023   : > { %3163 = vrot.lane.b32.xlu1 %v2866_v26, %s5257_s0  ;;  %s674_s0 = sand.u32 1, %s5243_s28  }
0x1024   : > { %s675_s22 = scalar_lea.vmem [#allocation2], %s674_s0  ;;  %s4479_s24 = scalar_lea.sflag [#allocation3], %s674_s0 }
0x109b   : > { %v3619_v27 = vpop.xlane.xlu0 %3618 }
0x109c   : > { %v3629_v28 = vsub.f32 %v3613_v9, %v3619_v27 }
0x109e   : > { %v3633_v29 = vmul.f32 1.442695, %v3629_v28 }
0x109f   : > { %v3625_v43 = vpop.xlane.xlu0 %3624  ;;  %v3622_v31 = vpop.xlane.xlu1 %3621 }
0x10a0   : > { %5165 = vpow2.f32 %v3633_v29  ;;  %v3631_v22 = vsub.f32 %v3615_v13, %v3625_v43  ;;  %v3630_v32 = vsub.f32 %v3614_v14, %v3622_v31 }
0x10a2   : > { %v3637_v33 = vmul.f32 1.442695, %v3631_v22  ;;  %v3635_v34 = vmul.f32 1.442695, %v3630_v32 }
0x10a3   : > { %v3628_v35 = vpop.xlane.xlu0 %3627  ;;  %v3164_v49 = vpop.permute.xlu1 %3163 }
0x10a4   : > { %5167 = vpow2.f32 %v3637_v33  ;;  %v3632_v39 = vsub.f32 %v3616_v20, %v3628_v35  ;;  %v3169_v54 = vcombine.low %v2866_v26, %v3164_v49  ;;  %v3170_v55 = vcombine.high %v2866_v26, %v3164_v49 }
0x10a5   : > { %5169 = vpow2.f32 %v3635_v34 }
0x10a6   : > { %v3639_v37 = vmul.f32 1.442695, %v3632_v39  ;;  %v3177_v60 = vrot.slane %v3169_v54, %v5545_v23  ;;  %v3184_v61 = vrot.slane %v3170_v55, %v5545_v23 }
0x10a8   : > { %5171 = vpow2.f32 %v3639_v37 }
0x10aa   : > { %v5900_v38 = vpop.eup %5165 }
0x10ab   : > { %v3641_v40 = vsel %vm1534_vm3, %v5900_v38, 0.0 }
0x10ac   : > { %3642 = vadd.xlane.f32.xlu0 %v3641_v40 }
0x10ae   : > { %v5904_v41 = vpop.eup %5167 }
0x10af   : > { %v5170_v42 = vpop.eup %5169  ;;  %v3647_v45 = vsel %vm1534_vm3, %v5904_v41, 0.0 }
0x10b0   : > { %v3644_v46 = vsel %vm1534_vm3, %v5170_v42, 0.0  ;;  %3648 = vadd.xlane.f32.xlu0 %v3647_v45 }
0x10b1   : > { %3645 = vadd.xlane.f32.xlu1 %v3644_v46 }
0x10b2   : > { %v5909_v47 = vpop.eup %5171 }
0x10b3   : > { %v3650_v48 = vsel %vm1534_vm3, %v5909_v47, 0.0 }
0x10b5   : > { %3651 = vadd.xlane.f32.xlu1 %v3650_v48 }
0x10c6   : > { %3166 = vrot.lane.b32.xlu1 %v2866_v26, %s5258_s1  ;;  %3160 = vrot.lane.b32.xlu0 %v2866_v26, %s5256_s5  ;;  %s4740_s1 = sshll.u32 %s5401_s4, 4  ;;  %s5264_s4 = smov [#allocation2]  }
0x10c7   : > { %s6067_s29 = scalar_lea.hbm %s6170_s2, %s4740_s1  ;;  %s5193_s5 = sshll.u32 %s5264_s4, 4  ;;  %s5194_s5 = int_to_ptr.vmem [resolvable:$false] %s5193_s5 }
0x10c8   : > { %s5195_s1 = scalar_lea.vmem %s5194_s5, 32 }
0x1139   : > { %v3643_v50 = vpop.xlane.xlu0 %3642 }
0x113a   : > { %5173 = vrcp.f32 %v3643_v50 }
0x113d   : > { %v3649_v52 = vpop.xlane.xlu0 %3648 }
0x113e   : > { %v3646_v51 = vpop.xlane.xlu1 %3645 }
0x113f   : > { %5175 = vrcp.f32 %v3646_v51 }
0x1140   : > { %5177 = vrcp.f32 %v3649_v52 }
0x1141   : > { %v3161_v56 = vpop.permute.xlu0 %3160 }
0x1142   : > { %v3652_v53 = vpop.xlane.xlu1 %3651 }
0x1143   : > { %5179 = vrcp.f32 %v3652_v53 }
0x1144   : > { %v5174_v17 = vpop.eup %5173 }
0x1145   : > { %v3657_v22 = vmul.f32 %v5174_v17, %v5900_v38 }
0x1146   : > { %v3167_v57 = vpop.permute.xlu1 %3166 }
0x1147   : > { %v3185_v58 = vcombine.low %v3161_v56, %v3167_v57  ;;  %v3186_v59 = vcombine.high %v3161_v56, %v3167_v57 }
0x1149   : > { %v3193_v62 = vrot.slane %v3185_v58, %v5545_v23  ;;  %v3200_v63 = vrot.slane %v3186_v59, %v5545_v23  ;;  %v5176_v24 = vpop.eup %5175 }
0x114a   : > { %v5178_v26 = vpop.eup %5177  ;;  %v3658_v32 = vmul.f32 %v5176_v24, %v5170_v42 }
0x114b   : > { %v3201_v0 = vcombine.low %v3177_v60, %v3193_v62  ;;  %v3202_v2 = vcombine.high %v3177_v60, %v3193_v62  ;;  %v3217_v3 = vcombine.low %v3184_v61, %v3200_v63  ;;  %v3218_v4 = vcombine.high %v3184_v61, %v3200_v63  ;;  %v5123_v60 = vld [vmem:[%s6119_s10 + $0x10] sm:$0xff]  }
0x114c   : > { %v3659_v35 = vmul.f32 %v5178_v26, %v5904_v41 }
0x114d   : > { %v3209_v5 = vrot.slane %v3201_v0, %v5547_v30  ;;  %v3216_v6 = vrot.slane %v3202_v2, %v5547_v30  ;;  %v3225_v7 = vrot.slane %v3217_v3, %v5547_v30  ;;  %v3232_v9 = vrot.slane %v3218_v4, %v5547_v30  ;;  %v5180_v31 = vpop.eup %5179 }
0x114e   : > { %v3660_v39 = vmul.f32 %v5180_v31, %v5909_v47 }
0x114f   : > { %v3237_v10 = vcombine.low %v3209_v5, %v3216_v6  ;;  %v4672_v11 = vcombine.high %v3209_v5, %v3216_v6  ;;  %v3253_v12 = vcombine.low %v3225_v7, %v3232_v9  ;;  %v4673_v8 = vcombine.high %v3225_v7, %v3232_v9  ;;  %v5124_v6 = vld [vmem:[%s6119_s10 + $0x18] sm:$0xff]  }
0x1151   : > { %v3244_v13 = vrot.slane %v3237_v10, %v5545_v23  ;;  %v3252_v14 = vrot.slane %v4672_v11, %v5545_v23  ;;  %v3260_v15 = vrot.slane %v3253_v12, %v5545_v23  ;;  %v3268_v16 = vrot.slane %v4673_v8, %v5545_v23 }
0x1153   : > { %v3269_v18 = vcombine.low %v3244_v13, %v3252_v14  ;;  %v3285_v19 = vcombine.low %v3260_v15, %v3268_v16  ;;  %v3270_v20 = vcombine.high %v3244_v13, %v3252_v14  ;;  %v3286_v21 = vcombine.high %v3260_v15, %v3268_v16 }
0x1155   : > { %v3277_v36 = vrot.slane %v3269_v18, %v5547_v30  ;;  %v3293_v25 = vrot.slane %v3285_v19, %v5547_v30  ;;  %v3284_v27 = vrot.slane %v3270_v20, %v5547_v30  ;;  %v3300_v28 = vrot.slane %v3286_v21, %v5547_v30 }
0x1157   : > { %v3301_v29 = vcombine.low %v3277_v36, %v3293_v25  ;;  %v3302_v43 = vcombine.high %v3277_v36, %v3293_v25  ;;  %v3303_v33 = vcombine.low %v3284_v27, %v3300_v28  ;;  %v3304_v34 = vcombine.high %v3284_v27, %v3300_v28 }
0x1159   : > { %4972 = vmatpush3.msra.mxu0 %v3301_v29  ;;  %4977 = vmatpush3.msra.mxu1 %v3302_v43  ;;  %v4696_v43 = vld [vmem:[%s6120_s11 + $0x1] ss:$0 sm:$0xff] }
0x115a   : > { %4974 = vmatmul.mubr.msk.f32.vlgmr.msra.gmra.mrb[10].mxu0 %vm1534_vm3, %v3657_v22  ;;  %4979 = vmatmul.mubr.msk.f32.vlgmr.msra.gmra.mrb[54].mxu1 %vm1534_vm3, %v3658_v32 }
0x115b   : > { %4981 = vmatprep.subr.mxu0 %v5254_v44  ;;  %4986 = vmatprep.subr.mxu1 %v5254_v44 }
0x115c   : > { %4982 = vmatpush3.msra.mxu0 %v3303_v33  ;;  %4987 = vmatpush3.msra.mxu1 %v3304_v34 }
0x115d   : > { %4983 = vmatprep.mubr.msk.f32.mxu0 %vm5255_vm2, %v5254_v44  ;;  %4988 = vmatprep.mubr.msk.f32.mxu1 %vm5255_vm2, %v5254_v44 }
0x115e   : > { %4984 = vmatmul.mubr.msk.f32.vlgmr.msra.gmra.mrb[12].mxu0 %vm1534_vm3, %v3659_v35  ;;  %4989 = vmatmul.mubr.msk.f32.vlgmr.msra.gmra.mrb[56].mxu1 %vm1534_vm3, %v3660_v39 }
0x115f   : > { %4991 = vmatprep.subr.bf16.mxu0 %v5254_v44  ;;  %4995 = vmatprep.mubr.msk.bf16.mxu0 %vm5255_vm2, %v5254_v44 }
0x1160   : > { %4999 = vmatprep.subr.bf16.mxu1 %v5254_v44  ;;  %5003 = vmatprep.mubr.msk.bf16.mxu1 %vm5255_vm2, %v5254_v44 }
0x1161   : > { %4992 = vmatpush3.bf16.msra.mxu0 %v5123_v60  ;;  %v5132_v60 = vld [vmem:[%s6125_s16 + $0x68] sm:$0xff]  }
0x1162   : > { %4993 = vmatprep.subr.bf16.mxu0 %v5254_v44 }
0x1165   : > { %4994 = vmatpush3.bf16.msra.mxu0 %v5124_v6 }
0x1166   : > { %5007 = vmatprep.subr.bf16.mxu0 %v5254_v44 }
0x122d   : > { %v3730_v37 = vpop.f32.mrb[10].mxu0  ;;  %v3803_v38 = vpop.f32.mrb[54].mxu1 }
0x122e   : > { %v4975_v40 = vpop.f32.mrb[11].mxu0  ;;  %v4980_v41 = vpop.f32.mrb[55].mxu1 }
0x1231   : > { %v3876_v42 = vpop.f32.mrb[12].mxu0  ;;  %v3949_v45 = vpop.f32.mrb[56].mxu1 }
0x1232   : > { %v3953_v46 = vcombine.low %v3730_v37, %v3876_v42  ;;  %v3954_v47 = vcombine.high %v3730_v37, %v3876_v42  ;;  %v3969_v48 = vcombine.low %v3803_v38, %v3949_v45  ;;  %v3970_v49 = vcombine.high %v3803_v38, %v3949_v45  ;;  %v4985_v50 = vpop.f32.mrb[13].mxu0  ;;  %v4990_v51 = vpop.f32.mrb[57].mxu1  ;;  %v5126_v42 = vld [vmem:[%s6123_s14 + $0x18] sm:$0xff]  }
0x1233   : > { %v4700_v51 = vld [vmem:[%s6122_s13 + $0x1] ss:$0 sm:$0xff] }
0x1234   : > { %v3961_v52 = vrot.slane %v3953_v46, %v5545_v23  ;;  %v3968_v53 = vrot.slane %v3954_v47, %v5545_v23  ;;  %v3977_v54 = vrot.slane %v3969_v48, %v5545_v23  ;;  %v3984_v55 = vrot.slane %v3970_v49, %v5545_v23  ;;  %v4699_v49 = vld [vmem:[%s6121_s12 + $0x1] ss:$0 sm:$0xff] }
0x1236   : > { %v3985_v56 = vcombine.low %v3961_v52, %v3977_v54  ;;  %v3986_v57 = vcombine.high %v3961_v52, %v3977_v54  ;;  %v4001_v58 = vcombine.low %v3968_v53, %v3984_v55  ;;  %v4002_v59 = vcombine.high %v3968_v53, %v3984_v55  ;;  %v5127_v55 = vld [vmem:[%s6125_s16 + $0x40] sm:$0xff]  }
0x1238   : > { %v3993_v61 = vrot.slane %v3985_v56, %v5547_v30  ;;  %v4000_v62 = vrot.slane %v3986_v57, %v5547_v30  ;;  %v4009_v63 = vrot.slane %v4001_v58, %v5547_v30  ;;  %v4016_v0 = vrot.slane %v4002_v59, %v5547_v30  ;;  %v5128_v56 = vld [vmem:[%s6125_s16 + $0x48] sm:$0xff]   ;;  %v5129_v57 = vld [vmem:[%s6125_s16 + $0x50] sm:$0xff]   ;;  %v5130_v58 = vld [vmem:[%s6125_s16 + $0x58] sm:$0xff]  }
0x1239   : > { %v5131_v59 = vld [vmem:[%s6125_s16 + $0x60] sm:$0xff]  }
0x123a   : > { %v4021_v2 = vcombine.low %v3993_v61, %v4000_v62  ;;  %v4686_v3 = vcombine.high %v3993_v61, %v4000_v62  ;;  %v4037_v4 = vcombine.low %v4009_v63, %v4016_v0  ;;  %v4687_v5 = vcombine.high %v4009_v63, %v4016_v0  ;;  %v5133_v61 = vld [vmem:[%s6125_s16 + $0x70] sm:$0xff]   ;;  %v5134_v62 = vld [vmem:[%s6125_s16 + $0x78] sm:$0xff]   ;;  %v4706_v63 = vld [vmem:[%s6124_s15 + $0x1] ss:$0 sm:$0xff] }
0x123c   : > { %v4028_v7 = vrot.slane %v4021_v2, %v5545_v23  ;;  %v4036_v9 = vrot.slane %v4686_v3, %v5545_v23  ;;  %v4044_v10 = vrot.slane %v4037_v4, %v5545_v23  ;;  %v4052_v11 = vrot.slane %v4687_v5, %v5545_v23 }
0x123e   : > { %v4054_v12 = vcombine.high %v4028_v7, %v4036_v9  ;;  %v4070_v8 = vcombine.high %v4044_v10, %v4052_v11  ;;  %v4053_v13 = vcombine.low %v4028_v7, %v4036_v9  ;;  %v4069_v14 = vcombine.low %v4044_v10, %v4052_v11 }
0x1240   : > { %v4068_v15 = vrot.slane %v4054_v12, %v5547_v30  ;;  %v4084_v16 = vrot.slane %v4070_v8, %v5547_v30  ;;  %v4061_v17 = vrot.slane %v4053_v13, %v5547_v30  ;;  %v4077_v18 = vrot.slane %v4069_v14, %v5547_v30  ;;  %v4728_v13 = vld [vmem:[%s6126_s17 + $0x1] ss:$0 sm:$0xff] }
0x1242   : > { %v4087_v19 = vcombine.low %v4068_v15, %v4084_v16  ;;  %v4086_v20 = vcombine.high %v4061_v17, %v4077_v18  ;;  %v4088_v21 = vcombine.high %v4068_v15, %v4084_v16  ;;  %v4085_v24 = vcombine.low %v4061_v17, %v4077_v18 }
0x1244   : > { %4094 = vrot.lane.b32.xlu0 %v4087_v19, %s6167_s23  ;;  %4090 = vrot.lane.b32.xlu1 %v4086_v20, %s6168_s26  ;;  %s4491_s23 = sshll.u32 %s675_s22, 4  ;;  %s6069_s23 = int_to_ptr.vmem [resolvable:$true] %s4491_s23 }
0x1245   : > { %s5189_s30 = scalar_lea.vmem %s6069_s23, 16  ;;  %p5196_p0 = scmp.lt.s32.totalorder %s6069_s23, %s5194_s5 }
0x1246   : > { %p5190_p11 = scmp.ne.s32.totalorder %s6069_s23, %s5189_s30  ;;  %p5197_p1 = scmp.lt.s32.totalorder %s5195_s1, %s5189_s30 }
0x1248   : > { %4098 = vrot.lane.b32.xlu1 %v4088_v21, %s6169_s3  ;;  %p5191_p12 = pnand %p5190_p11, %p5418_p5  ;;  %p5198_p2 = por %p5197_p1, %p5196_p0 }
0x124a   : > { %p5192_p13 = pneg %p5191_p12 }
0x124c   : > { %p5199_p3 = pnand %p5198_p2, %p5192_p13 }
0x12b6   : > { %v4091_v23 = vpop.permute.xlu1 %4090  ;;  %v4095_v36 = vpop.permute.xlu0 %4094 }
0x12b7   : > { %v4101_v25 = vsel %vm1534_vm3, %v4085_v24, %v4091_v23 }
0x12b8   : > { %v4102_v27 = vsel %vm2338_vm4, %v4101_v25, %v4095_v36 }
0x12ba   : > { %v4099_v26 = vpop.permute.xlu1 %4098 }
0x12bb   : > { %v4103_v28 = vsel %vm2340_vm5, %v4102_v27, %v4099_v26  ;;  %v5135_v26 = vld [vmem:[%s6130_s21] sm:$0xff]   ;;  %v5136_v27 = vld [vmem:[%s6130_s21 + $0x8] sm:$0xff]  }
0x12bc   : > { %v4104_v30 = vpack.c.bf16 %v4103_v28, %v4103_v28 }
0x12be   : > { %4996 = vmatmul.mubr.msk.bf16.vlgmr.msra.gmra.mrb[16].mxu0 %vm832_vm1, %v4104_v30 }
0x12bf   : > { %5023 = vmatprep.mubr.msk.bf16.mxu0 %vm5255_vm2, %v5254_v44  ;;  %5008 = vmatpush3.bf16.msra.mxu0 %v5127_v55 }
0x12c0   : > { %5009 = vmatprep.subr.bf16.mxu0 %v5254_v44 }
0x12c3   : > { %5010 = vmatpush3.bf16.msra.mxu0 %v5128_v56 }
0x12c4   : > { %5011 = vmatprep.subr.bf16.mxu0 %v5254_v44 }
0x12c7   : > { %5012 = vmatpush3.bf16.msra.mxu0 %v5129_v57 }
0x12c8   : > { %5013 = vmatprep.subr.bf16.mxu0 %v5254_v44 }
0x12cb   : > { %5014 = vmatpush3.bf16.msra.mxu0 %v5130_v58 }
0x12cc   : > { %5015 = vmatprep.subr.bf16.mxu0 %v5254_v44 }
0x12cf   : > { %5016 = vmatpush3.bf16.msra.mxu0 %v5131_v59 }
0x12d0   : > { %5017 = vmatprep.subr.bf16.mxu0 %v5254_v44 }
0x12d3   : > { %5018 = vmatpush3.bf16.msra.mxu0 %v5132_v60 }
0x12d4   : > { %5019 = vmatprep.subr.bf16.mxu0 %v5254_v44 }
0x12d7   : > { %5020 = vmatpush3.bf16.msra.mxu0 %v5133_v61 }
0x12d8   : > { %5021 = vmatprep.subr.bf16.mxu0 %v5254_v44 }
0x12db   : > { %5022 = vmatpush3.bf16.msra.mxu0 %v5134_v62 }
0x1391   : > { %v4159_v29 = vpop.f32.mrb[16].mxu0 }
0x1392   : > { %v4165_v31 = vadd.f32 %v4159_v29, %v5773_v1  ;;  %v4997_v22 = vpop.f32.mrb[17].mxu0  ;;  %v5125_v1 = vld [vmem:[%s6123_s14 + $0x10] sm:$0xff]  }
0x1393   : > { %v4162_v32 = vpop.f32.mrb[18].mxu0  ;;  %5000 = vmatpush3.bf16.msra.mxu1 %v5125_v1 }
0x1394   : > { %v5987_v33 = vadd.f32 %v4696_v43, %v4165_v31  ;;  %v4998_v34 = vpop.f32.mrb[19].mxu0  ;;  %5001 = vmatprep.subr.bf16.mxu1 %v5254_v44  ;;  %v4398_v31 = vld [vmem:[%s6128_s19] sm:$0x1] }
0x1395   : > { %v4399_v32 = vld [vmem:[%s6129_s20] sm:$0x1] }
0x1396   : > { %v4179_v35 = vsel %vm832_vm1, %v5987_v33, 0.0 }
0x1397   : > { %4180 = vadd.xlane.f32.xlu0 %v4179_v35  ;;  %5002 = vmatpush3.bf16.msra.mxu1 %v5126_v42 }
0x1398   : > { %5027 = vmatprep.subr.bf16.mxu1 %v5254_v44 }
0x1424   : > { %v4181_v39 = vpop.xlane.xlu0 %4180 }
0x1425   : > { %v4182_v37 = vmul.f32 0.03125, %v4181_v39 }
0x1427   : > { %v4183_v38 = vsub.f32 %v5987_v33, %v4182_v37 }
0x1429   : > { %v4184_v40 = vmul.f32 %v4183_v38, %v4183_v38 }
0x142b   : > { %v4185_v41 = vsel %vm832_vm1, %v4184_v40, 0.0 }
0x142c   : > { %4186 = vadd.xlane.f32.xlu1 %v4185_v41 }
0x14b9   : > { %v4187_v45 = vpop.xlane.xlu1 %4186 }
0x14ba   : > { %v4188_v46 = vmul.f32 0.03125, %v4187_v45 }
0x14bc   : > { %v4189_v47 = vadd.f32 1e-05, %v4188_v46 }
0x14be   : > { %5181 = vrsqrt.f32 %v4189_v47 }
0x14c8   : > { %v5182_v48 = vpop.eup %5181 }
0x14c9   : > { %v4191_v50 = vmul.f32 %v5182_v48, %v4183_v38 }
0x14cb   : > { %v4198_v52 = vmul.f32 %v4699_v49, %v4191_v50 }
0x14cd   : > { %v4205_v53 = vadd.f32 %v4700_v51, %v4198_v52 }
0x14cf   : > { %v4206_v54 = vpack.c.bf16 %v4205_v53, %v4205_v53 }
0x14d1   : > { %5004 = vmatmul.mubr.msk.bf16.vlgmr.msra.gmra.mrb[60].mxu1 %vm832_vm1, %v4206_v54 }
0x14d2   : > { %5031 = vmatprep.mubr.msk.bf16.mxu1 %vm5255_vm2, %v5254_v44  ;;  %5028 = vmatpush3.bf16.msra.mxu1 %v5135_v26 }
0x14d3   : > { %5029 = vmatprep.subr.bf16.mxu1 %v5254_v44 }
0x14d6   : > { %5030 = vmatpush3.bf16.msra.mxu1 %v5136_v27 }
0x15a4   : > { %v4269_v0 = vpop.f32.mrb[60].mxu1 }
0x15a5   : > { %v4270_v2 = vadd.f32 %v4706_v63, %v4269_v0  ;;  %v5005_v3 = vpop.f32.mrb[61].mxu1 }
0x15a6   : > { %v4272_v4 = vpop.f32.mrb[62].mxu1 }
0x15a7   : > { %v4710_v5 = vmul.f32 -1.702, %v4270_v2  ;;  %v5006_v6 = vpop.f32.mrb[63].mxu1 }
0x15a9   : > { %v4277_v7 = vmul.f32 1.442695, %v4710_v5 }
0x15ab   : > { %5183 = vpow2.f32 %v4277_v7 }
0x15b5   : > { %v5184_v9 = vpop.eup %5183 }
0x15b6   : > { %v4279_v10 = vadd.f32 1.0, %v5184_v9 }
0x15b8   : > { %5185 = vrcp.f32 %v4279_v10 }
0x15c2   : > { %v5186_v11 = vpop.eup %5185 }
0x15c3   : > { %v4282_v12 = vmul.f32 %v5186_v11, %v4270_v2 }
0x15c5   : > { %v4283_v8 = vpack.c.bf16 %v4282_v12, %v4282_v12 }
0x15c7   : > { %5024 = vmatmul.mubr.bf16.vlgmr.msra.gmra.mrb[20].mxu0 %v4283_v8 }
0x169a   : > { %v4391_v14 = vpop.f32.mrb[20].mxu0 }
0x169b   : > { %v4392_v15 = vadd.f32 %v4728_v13, %v4391_v14  ;;  %v5025_v16 = vpop.f32.mrb[21].mxu0 }
0x169c   : > { %v4394_v17 = vpop.f32.mrb[22].mxu0 }
0x169d   : > { %v5026_v18 = vpop.f32.mrb[23].mxu0  ;;  %v4397_v19 = vadd.f32 %v4392_v15, %v5987_v33 }
0x169f   : > { %v4401_v20 = vsel %vm4400_vm6, %v4397_v19, 0.0 }
0x16a0   : > { %4402 = vadd.xlane.f32.xlu0 %v4401_v20 }
0x172d   : > { %v4403_v21 = vpop.xlane.xlu0 %4402 }
0x172e   : > { %v4404_v24 = vmul.f32 0.03125, %v4403_v21 }
0x1730   : > { %v4405_v23 = vsub.f32 %v4397_v19, %v4404_v24 }
0x1732   : > { %v4406_v36 = vmul.f32 %v4405_v23, %v4405_v23 }
0x1734   : > { %v4407_v25 = vsel %vm4400_vm6, %v4406_v36, 0.0 }
0x1735   : > { %4408 = vadd.xlane.f32.xlu0 %v4407_v25 }
0x17c2   : > { %v4409_v28 = vpop.xlane.xlu0 %4408 }
0x17c3   : > { %v4410_v30 = vmul.f32 0.03125, %v4409_v28 }
0x17c5   : > { %v4411_v29 = vadd.f32 1e-05, %v4410_v30 }
0x17c7   : > { %5187 = vrsqrt.f32 %v4411_v29 }
0x17d1   : > { %v5188_v43 = vpop.eup %5187 }
0x17d2   : > { %v4413_v22 = vmul.f32 %v5188_v43, %v4405_v23 }
0x17d4   : > { %v4414_v33 = vmul.f32 %v4413_v22, %v4398_v31 }
0x17d6   : > { %v4415_v34 = vadd.f32 %v4414_v33, %v4399_v32 }
0x17d8   : > { %v4416_v35 = vpack.c.bf16 %v4415_v34, %v4415_v34 }
0x17da   : > { %5032 = vmatmul.mubr.msk.bf16.vlgmr.msra.gmra.mrb[64].mxu1 %vm832_vm1, %v4416_v35 }
0x18ad   : > { %v4470_v44 = vpop.f32.mrb[64].mxu1 }
0x18ae   : > { %4477 = vst.msk [vmem:[%s675_s22] sm:$0x1] %vm4476_vm7, %v4470_v44  ;;  %v5033_v39 = vpop.f32.mrb[65].mxu1 }
0x18af   : > { %v4473_v37 = vpop.f32.mrb[66].mxu1 }
0x18b0   : > { %5202 = shalt.err (!%p5199_p3)
}
0x18b1   : > { %s5203_s0 = scalar_lea.hbm %s6067_s29, 16  ;;  %s5207_s3 = scalar_lea.hbm %s6170_s2, 32 }
0x18b2   : > { %p5204_p4 = scmp.ne.s32.totalorder %s6067_s29, %s5203_s0  ;;  %p5208_p9 = scmp.lt.u32.totalorder %s6067_s29, %s6170_s2 }
0x18b3   : > { %p5209_p10 = scmp.lt.u32.totalorder %s5207_s3, %s5203_s0  ;;  %p5211_p12 = scmp.lt.u32.totalorder %s5203_s0, %s6067_s29 }
0x18b4   : > { %p5205_p7 = pnand %p5204_p4, %p5418_p5 }
0x18b5   : > { %p5210_p11 = por %p5209_p10, %p5208_p9 }
0x18b6   : > { %p5206_p8 = pneg %p5205_p7 }
0x18b7   : > { %p5212_p13 = por %p5211_p12, %p5210_p11 }
0x18b9   : > { %p5213_p0 = pnand %p5212_p13, %p5206_p8 }
0x18bb   : > { %5216 = shalt.err (!%p5213_p0)
}
0x18bc   : > { %5035 = dma.vmem_to_hbm [thread:$0]  (%p5418_p5), %s6069_s23, 16, %s6067_s29, %s4479_s24   ;;  %v5034_v38 = vpop.f32.mrb[67].mxu1 }
0x18bd PF: > { %s6171_s30 = sld [smem:[#allocation7_spill]]  ;;  %s6172_s1 = sld [smem:[#allocation5_spill]] }
0x18c3   : > { %p5041_p1 = scmp.ge.s32.totalorder %s6171_s30, 2  ;;  %s4503_s26 = sand.u32 1, %s6172_s1  }
0x18c4   : > { %s4504_s3 = scalar_lea.sflag [#allocation3], %s4503_s26 }
0x18c5   : > { %p5038_p2 = pnand %p5041_p1, %p5422_p6 }
0x18c7   : > { %5234 = dma.done.wait (!%p5038_p2), %s4504_s3, 16  }
0x18c8   : > { %5236 = vsyncadd (!%p5038_p2), %s4504_s3, 4294967280  ;;  %s6174_s30 = sld [smem:[#allocation8_spill]]  ;;  %s6175_s0 = sld [smem:[#allocation6_spill]] }
0x18c9   : > { %s6176_s29 = sld [smem:[#allocation9_spill]]  ;;  %s6177_s3 = smov %s5243_s28 }
0x18ce   : > { %p32_p3 = scmp.ge.s32.totalorder %s6174_s30, 4   ;;  %s6178_s28 = smov %s6175_s0 }
0x18d0   :  { %34 = sbr.rel (!%p32_p3) target bundleno = 12 (0xc), region = 164 }
0x18d7   :  { %4508 = vsyncpa [#allocation3], 1 }
0x18d8   :  { %4510 = vsyncpa [#allocation3 + $0x1], 1 }

</bundles_post_ra>
